<compile_context>
chip_gen: v6e
topology: v6e:2x2x1
jax: 0.10.0
libtpu: 0.0.40
codegen_flags: <defaults>
</compile_context>

<pallas_src>
import functools

import jax
import jax.numpy as jnp
from jax.experimental import pallas as pl
from jax.experimental.pallas import tpu as pltpu

START_TAG = 8
STOP_TAG = 9
NEG_INF = -10000.0


def _ceil8(x):
    return ((x + 7) // 8) * 8


# ----------------------------------------------------------------------------
# Fused kernel: BiLSTM + Linear projection + CRF negative log-likelihood
# ----------------------------------------------------------------------------
def lstm_crf_fused_kernel(xpair_ref, w16_ref, w32_ref, labels_ref,   # inputs
                          loss_ref,                                  # output
                          gx_ref, hf_ref, hb_ref, feats_ref,         # VMEM scratch
                          *, T, B, Bp, H2, K, Dp,
                          r_wlf, r_wlb, r_bl, r_tr, r_et):
    f32 = jnp.float32
    G8 = 8 * H2
    H6 = 6 * H2

    # ---- unpack weights (static offsets, one-time loads) ----
    wih16 = w16_ref[0:2 * Dp, :]                    # [2*Dp, 8*H2] bf16 block-diag
    whh16 = w16_ref[2 * Dp:2 * Dp + 2 * H2, :]      # [2*H2, 8*H2] bf16 block-diag
    b_all = w32_ref[0:1, 0:G8]                      # [1, 8*H2]
    wlinf_t = w32_ref[r_wlf:r_wlf + H2, 0:K]        # [H2, K]  (fwd half of Linear)
    wlinb_t = w32_ref[r_wlb:r_wlb + H2, 0:K]        # [H2, K]  (bwd half of Linear)
    blin = w32_ref[r_bl:r_bl + 1, 0:K]              # [1, K]
    trans = w32_ref[r_tr:r_tr + K, 0:K]             # [K, K]   trans[next, prev]
    etrans_t = w32_ref[r_et:r_et + K, 0:K]          # [K, K]   exp(trans).T (prev, next)

    # ---- hoisted input projection: both directions & both time orders, ONE matmul ----
    gx_ref[...] = (jnp.dot(xpair_ref[...], wih16,
                           preferred_element_type=f32) + b_all)      # [T*Bp, 8*H2]

    # ---- interleaved fwd/bwd LSTM recurrence (fully unrolled, T static) ----
    c_cat = jnp.zeros((Bp, 2 * H2), f32)             # [c_f | c_b]
    h16 = jnp.zeros((Bp, 2 * H2), jnp.bfloat16)      # [h_f | h_b] (bf16 MXU operand)
    for s in range(T):
        tb = T - 1 - s
        g = (gx_ref[s * Bp:(s + 1) * Bp, :]
             + jnp.dot(h16, whh16, preferred_element_type=f32))      # [Bp, 8*H2]
        sig = jax.nn.sigmoid(g[:, 0:H6])             # i|f|o gates of BOTH dirs, one EUP op
        gg = jnp.tanh(g[:, H6:G8])                   # g gates of both dirs
        c_cat = sig[:, 2 * H2:4 * H2] * c_cat + sig[:, 0:2 * H2] * gg
        h_cat = sig[:, 4 * H2:6 * H2] * jnp.tanh(c_cat)
        hf_ref[s * Bp:(s + 1) * Bp, :] = h_cat[:, 0:H2]        # forward h at time s
        hb_ref[tb * Bp:(tb + 1) * Bp, :] = h_cat[:, H2:2 * H2]  # backward h at time tb
        h16 = h_cat.astype(jnp.bfloat16)

    # TODO(synk): nn.Dropout is treated as eval-mode identity (deterministic forward).
    # ---- output projection over all T*Bp rows (off the serial chain, f32) ----
    feats = (jnp.dot(hf_ref[...], wlinf_t, preferred_element_type=f32)
             + jnp.dot(hb_ref[...], wlinb_t, preferred_element_type=f32)
             + blin)                                                  # [T*Bp, K]
    feats_ref[...] = feats

    # ---- CRF forward algorithm (scaled exp-space; matmul does the prev-tag sum) ----
    lane = jax.lax.broadcasted_iota(jnp.int32, (Bp, K), 1)
    fv = jnp.where(lane == START_TAG, 0.0, NEG_INF).astype(f32)       # [Bp, K]
    for t in range(T):
        feat = feats_ref[t * Bp:(t + 1) * Bp, :]                      # [Bp, K]
        m = jnp.max(fv, axis=-1, keepdims=True)                       # [Bp, 1]
        p = jnp.exp(fv - m)                                           # [Bp, K]
        s_acc = jnp.dot(p, etrans_t, preferred_element_type=f32)      # [Bp, K]
        fv = feat + m + jnp.log(s_acc)

    stop_row = trans[STOP_TAG:STOP_TAG + 1, :]                        # [1, K]
    terminal = fv + stop_row
    mt = jnp.max(terminal, axis=-1, keepdims=True)
    alpha = mt + jnp.log(jnp.sum(jnp.exp(terminal - mt), axis=-1, keepdims=True))  # [Bp,1]
    biota = jax.lax.broadcasted_iota(jnp.int32, (Bp, 1), 0)
    alpha_tot = jnp.sum(jnp.where(biota < B, alpha, 0.0), keepdims=True)            # [1,1]

    # ---- gold path score (padded batch columns carry label -1 -> contribute zero) ----
    kio = jax.lax.broadcasted_iota(jnp.int32, (T * Bp, K), 1)
    lab = labels_ref[...]
    oh_next = (lab[:, 0:1] == kio).astype(f32)                        # [T*Bp, K]
    oh_prev = (lab[:, 1:2] == kio).astype(f32)                        # [T*Bp, K]
    emit_tot = jnp.sum(feats * oh_next, keepdims=True)
    rows_t = jnp.dot(oh_next, trans, preferred_element_type=f32)      # trans[y_r, :]
    trans_tot = jnp.sum(rows_t * oh_prev, keepdims=True)
    stop_tot = jnp.sum(stop_row * oh_next[(T - 1) * Bp:T * Bp, :], keepdims=True)

    loss_ref[...] = (alpha_tot - emit_tot - trans_tot - stop_tot) / B


# ----------------------------------------------------------------------------
# Wrappers (plain-JAX glue: parameter setup, weight packing, pallas_call plumbing)
# ----------------------------------------------------------------------------
def make_params(key, n_hidden=32, tagset_size=10, input_dim=66):
    H2 = n_hidden // 2
    ks = jax.random.split(key, 9)
    s = 0.1
    p = {
        "wih_f": s * jax.random.normal(ks[0], (4 * H2, input_dim), jnp.float32),
        "whh_f": s * jax.random.normal(ks[1], (4 * H2, H2), jnp.float32),
        "b_f":   s * jax.random.normal(ks[2], (1, 4 * H2), jnp.float32),  # b_ih + b_hh
        "wih_b": s * jax.random.normal(ks[3], (4 * H2, input_dim), jnp.float32),
        "whh_b": s * jax.random.normal(ks[4], (4 * H2, H2), jnp.float32),
        "b_b":   s * jax.random.normal(ks[5], (1, 4 * H2), jnp.float32),
        "wlin":  s * jax.random.normal(ks[6], (tagset_size, n_hidden), jnp.float32),
        "blin":  s * jax.random.normal(ks[7], (1, tagset_size), jnp.float32),
    }
    trans = jax.random.normal(ks[8], (tagset_size, tagset_size), jnp.float32)
    trans = trans.at[START_TAG, :].set(NEG_INF)
    trans = trans.at[:, STOP_TAG].set(NEG_INF)
    p["transitions"] = trans
    return p


def _gate_blocks(w, H2):
    # PyTorch row order (i, f, g, o) -> reordered (i, f, o, g)
    return (w[0:H2], w[H2:2 * H2], w[3 * H2:4 * H2], w[2 * H2:3 * H2])


def lstm_crf_forward(features, labels, lengths, params):
    # TODO(synk): pack_padded_sequence / per-sequence length masking not modeled;
    # assumes all lengths == seq_len (full sequences).
    del lengths
    T, B, D = features.shape
    H2 = params["whh_f"].shape[1]
    K = params["wlin"].shape[0]
    G8 = 8 * H2
    Dp = ((D + 127) // 128) * 128          # pad feature dim to full lane tiles
    Bp = max(8, _ceil8(B))                 # pad batch to a full sublane tile

    # ---- gate-permuted, block-diagonal weight packs (all one-time, wrapper-side) ----
    wf = _gate_blocks(params["wih_f"], H2)
    wb = _gate_blocks(params["wih_b"], H2)
    uf = _gate_blocks(params["whh_f"], H2)
    ub = _gate_blocks(params["whh_b"], H2)

    def bias_blocks(b):
        return (b[:, 0:H2], b[:, H2:2 * H2], b[:, 3 * H2:4 * H2], b[:, 2 * H2:3 * H2])

    bfg = bias_blocks(params["b_f"])
    bbg = bias_blocks(params["b_b"])

    wih_blk = jnp.zeros((2 * Dp, G8), jnp.float32)
    whh_blk = jnp.zeros((2 * H2, G8), jnp.float32)
    b_cols = []
    col = 0
    for k in range(4):   # gate groups i, f, o, g
        wih_blk = wih_blk.at[0:D, col:col + H2].set(wf[k].T)
        whh_blk = whh_blk.at[0:H2, col:col + H2].set(uf[k].T)
        b_cols.append(bfg[k])
        col += H2
        wih_blk = wih_blk.at[Dp:Dp + D, col:col + H2].set(wb[k].T)
        whh_blk = whh_blk.at[H2:2 * H2, col:col + H2].set(ub[k].T)
        b_cols.append(bbg[k])
        col += H2
    b_all = jnp.concatenate(b_cols, axis=1)                         # [1, 8*H2]

    w16 = jnp.concatenate([wih_blk, whh_blk], axis=0).astype(jnp.bfloat16)

    # f32 pack: b_all | wlin fwd half | wlin bwd half | blin | trans | exp(trans).T
    r_wlf = 8
    r_wlb = r_wlf + _ceil8(H2)
    r_bl = r_wlb + _ceil8(H2)
    r_tr = r_bl + 8
    r_et = r_tr + _ceil8(K)
    nrows = r_et + _ceil8(K)
    W = max(128, G8)
    wlin = params["wlin"]
    trans = params["transitions"]
    w32 = jnp.zeros((nrows, W), jnp.float32)
    w32 = w32.at[0:1, 0:G8].set(b_all)
    w32 = w32.at[r_wlf:r_wlf + H2, 0:K].set(wlin[:, 0:H2].T)
    w32 = w32.at[r_wlb:r_wlb + H2, 0:K].set(wlin[:, H2:2 * H2].T)
    w32 = w32.at[r_bl:r_bl + 1, 0:K].set(params["blin"])
    w32 = w32.at[r_tr:r_tr + K, 0:K].set(trans)
    w32 = w32.at[r_et:r_et + K, 0:K].set(jnp.exp(trans).T)

    # ---- activations: [x(t) | x(T-1-t)] pairs so ONE aligned row-block per step
    #      feeds both directions of the fused recurrence ----
    xp = jnp.zeros((T, Bp, Dp), jnp.float32).at[:, :B, :D].set(features)
    xpair = jnp.concatenate([xp, xp[::-1]], axis=-1).reshape(T * Bp, 2 * Dp)
    xpair = xpair.astype(jnp.bfloat16)

    # ---- labels: [next | prev] per row; padded batch columns get -1 (auto-masked) ----
    labels = labels.astype(jnp.int32)
    lab_p = jnp.full((T, Bp), -1, jnp.int32).at[:, :B].set(labels)
    start_row = jnp.where(jnp.arange(Bp) < B, START_TAG, -1).astype(jnp.int32)[None, :]
    prev_p = jnp.concatenate([start_row, lab_p[:-1]], axis=0)
    labels2 = jnp.stack([lab_p, prev_p], axis=-1).reshape(T * Bp, 2)

    vmem = pl.BlockSpec(memory_space=pltpu.MemorySpace.VMEM)
    kern = functools.partial(
        lstm_crf_fused_kernel, T=T, B=B, Bp=Bp, H2=H2, K=K, Dp=Dp,
        r_wlf=r_wlf, r_wlb=r_wlb, r_bl=r_bl, r_tr=r_tr, r_et=r_et)

    # TODO(synk): once real batches span >=2 batch chunks, add a batch-chunk grid axis
    # with dimension_semantics=("parallel",) so v7x's second TensorCore gets used.
    loss = pl.pallas_call(
        kern,
        out_shape=jax.ShapeDtypeStruct((1, 1), jnp.float32),
        in_specs=[vmem, vmem, vmem, vmem],
        out_specs=vmem,
        scratch_shapes=[
            pltpu.VMEM((T * Bp, G8), jnp.float32),   # gates_x (both dirs, time-paired)
            pltpu.VMEM((T * Bp, H2), jnp.float32),   # forward hidden states
            pltpu.VMEM((T * Bp, H2), jnp.float32),   # backward hidden states
            pltpu.VMEM((T * Bp, K), jnp.float32),    # emission features
        ],
    )(xpair, w16, w32, labels2)
    return loss[0, 0]


if __name__ == "__main__":
    T, B, D_IN, N_HIDDEN, K = 8, 2, 66, 32, 10
    key = jax.random.PRNGKey(0)
    k_feat, k_lab, k_par = jax.random.split(key, 3)

    features = jax.random.normal(k_feat, (T, B, D_IN), jnp.float32)
    labels = jax.random.randint(k_lab, (T, B), 0, START_TAG).astype(jnp.int32)
    lengths = jnp.full((B,), T, jnp.int32)
    params = make_params(k_par, n_hidden=N_HIDDEN, tagset_size=K, input_dim=D_IN)

    loss = jax.jit(lstm_crf_forward)(features, labels, lengths, params)
    jax.block_until_ready(loss)
    assert loss.shape == () and bool(jnp.isfinite(loss))
    print("KERNEL_OK")
</pallas_src>

<mosaic_0001>
module attributes {stable_mosaic.version = 11 : i64} {
  func.func @lstm_crf_fused_kernel(%arg0: memref<64x256xbf16, #tpu.memory_space<vmem>>, %arg1: memref<288x128xbf16, #tpu.memory_space<vmem>>, %arg2: memref<80x128xf32, #tpu.memory_space<vmem>>, %arg3: memref<64x2xi32, #tpu.memory_space<vmem>>, %arg4: memref<1x1xf32, #tpu.memory_space<vmem>>, %arg5: memref<64x128xf32, #tpu.memory_space<vmem>>, %arg6: memref<64x16xf32, #tpu.memory_space<vmem>>, %arg7: memref<64x16xf32, #tpu.memory_space<vmem>>, %arg8: memref<64x10xf32, #tpu.memory_space<vmem>>) attributes {dimension_semantics = [], scalar_prefetch = 0 : i64, scratch_operands = 4 : i64, tpu.core_type = #tpu.core_type<tc>} {
    %c0 = arith.constant 0 : index
    %c0_0 = arith.constant 0 : index
    %0 = vector.load %arg1[%c0, %c0_0] : memref<288x128xbf16, #tpu.memory_space<vmem>>, vector<256x128xbf16>
    %c256 = arith.constant 256 : index
    %c0_1 = arith.constant 0 : index
    %1 = vector.load %arg1[%c256, %c0_1] : memref<288x128xbf16, #tpu.memory_space<vmem>>, vector<32x128xbf16>
    %c0_2 = arith.constant 0 : index
    %c0_3 = arith.constant 0 : index
    %2 = vector.load %arg2[%c0_2, %c0_3] : memref<80x128xf32, #tpu.memory_space<vmem>>, vector<1x128xf32>
    %c8 = arith.constant 8 : index
    %c0_4 = arith.constant 0 : index
    %3 = vector.load %arg2[%c8, %c0_4] : memref<80x128xf32, #tpu.memory_space<vmem>>, vector<16x10xf32>
    %c24 = arith.constant 24 : index
    %c0_5 = arith.constant 0 : index
    %4 = vector.load %arg2[%c24, %c0_5] : memref<80x128xf32, #tpu.memory_space<vmem>>, vector<16x10xf32>
    %c40 = arith.constant 40 : index
    %c0_6 = arith.constant 0 : index
    %5 = vector.load %arg2[%c40, %c0_6] : memref<80x128xf32, #tpu.memory_space<vmem>>, vector<1x10xf32>
    %c48 = arith.constant 48 : index
    %c0_7 = arith.constant 0 : index
    %6 = vector.load %arg2[%c48, %c0_7] : memref<80x128xf32, #tpu.memory_space<vmem>>, vector<10x10xf32>
    %c64 = arith.constant 64 : index
    %c0_8 = arith.constant 0 : index
    %7 = vector.load %arg2[%c64, %c0_8] : memref<80x128xf32, #tpu.memory_space<vmem>>, vector<10x10xf32>
    %c0_9 = arith.constant 0 : index
    %c0_10 = arith.constant 0 : index
    %8 = vector.load %arg0[%c0_9, %c0_10] : memref<64x256xbf16, #tpu.memory_space<vmem>>, vector<64x256xbf16>
    %cst = arith.constant dense<0.000000e+00> : vector<64x128xf32>
    %9 = tpu.matmul %8, %0, %cst {dimension_numbers = #tpu.dot_dimension_numbers<[1], [0], [0], [1], [0, 0, 1, 1], [], []>} : vector<64x256xbf16>, vector<256x128xbf16>, vector<64x128xf32> -> vector<64x128xf32>
    %10 = vector.broadcast %2 : vector<1x128xf32> to vector<64x128xf32>
    %11 = arith.addf %9, %10 : vector<64x128xf32>
    %c0_11 = arith.constant 0 : index
    %c0_12 = arith.constant 0 : index
    %12 = vector.load %arg5[%c0_11, %c0_12] : memref<64x128xf32, #tpu.memory_space<vmem>>, vector<64x128xf32>
    tpu.vector_store %arg5[%c0_11, %c0_12], %11 {strides = array<i32>} : memref<64x128xf32, #tpu.memory_space<vmem>>, vector<64x128xf32>,
    %cst_13 = arith.constant 0.000000e+00 : f32
    %13 = vector.broadcast %cst_13 : f32 to vector<8x32xf32>
    %cst_14 = arith.constant 0.000000e+00 : bf16
    %14 = vector.broadcast %cst_14 : bf16 to vector<8x32xbf16>
    %c0_15 = arith.constant 0 : index
    %c0_16 = arith.constant 0 : index
    %15 = vector.load %arg5[%c0_15, %c0_16] : memref<64x128xf32, #tpu.memory_space<vmem>>, vector<8x128xf32>
    %cst_17 = arith.constant dense<0.000000e+00> : vector<8x128xf32>
    %16 = tpu.matmul %14, %1, %cst_17 {dimension_numbers = #tpu.dot_dimension_numbers<[1], [0], [0], [1], [0, 0, 1, 1], [], []>} : vector<8x32xbf16>, vector<32x128xbf16>, vector<8x128xf32> -> vector<8x128xf32>
    %17 = arith.addf %15, %16 : vector<8x128xf32>
    %18 = vector.extract_strided_slice %17 {offsets = [0, 0], sizes = [8, 96], strides = [1, 1]} : vector<8x128xf32> to vector<8x96xf32>
    %19 = arith.negf %18 : vector<8x96xf32>
    %20 = math.exp %19 : vector<8x96xf32>
    %cst_18 = arith.constant 1.000000e+00 : f32
    %21 = vector.broadcast %cst_18 : f32 to vector<8x96xf32>
    %22 = arith.addf %21, %20 : vector<8x96xf32>
    %23 = arith.divf %21, %22 : vector<8x96xf32>
    %24 = vector.extract_strided_slice %17 {offsets = [0, 96], sizes = [8, 32], strides = [1, 1]} : vector<8x128xf32> to vector<8x32xf32>
    %25 = math.tanh %24 : vector<8x32xf32>
    %26 = vector.extract_strided_slice %23 {offsets = [0, 32], sizes = [8, 32], strides = [1, 1]} : vector<8x96xf32> to vector<8x32xf32>
    %27 = arith.mulf %26, %13 : vector<8x32xf32>
    %28 = vector.extract_strided_slice %23 {offsets = [0, 0], sizes = [8, 32], strides = [1, 1]} : vector<8x96xf32> to vector<8x32xf32>
    %29 = arith.mulf %28, %25 : vector<8x32xf32>
    %30 = arith.addf %27, %29 : vector<8x32xf32>
    %31 = vector.extract_strided_slice %23 {offsets = [0, 64], sizes = [8, 32], strides = [1, 1]} : vector<8x96xf32> to vector<8x32xf32>
    %32 = math.tanh %30 : vector<8x32xf32>
    %33 = arith.mulf %31, %32 : vector<8x32xf32>
    %34 = vector.extract_strided_slice %33 {offsets = [0, 0], sizes = [8, 16], strides = [1, 1]} : vector<8x32xf32> to vector<8x16xf32>
    %c0_19 = arith.constant 0 : index
    %c0_20 = arith.constant 0 : index
    %35 = vector.load %arg6[%c0_19, %c0_20] : memref<64x16xf32, #tpu.memory_space<vmem>>, vector<8x16xf32>
    tpu.vector_store %arg6[%c0_19, %c0_20], %34 {strides = array<i32>} : memref<64x16xf32, #tpu.memory_space<vmem>>, vector<8x16xf32>,
    %36 = vector.extract_strided_slice %33 {offsets = [0, 16], sizes = [8, 16], strides = [1, 1]} : vector<8x32xf32> to vector<8x16xf32>
    %c56 = arith.constant 56 : index
    %c0_21 = arith.constant 0 : index
    %37 = vector.load %arg7[%c56, %c0_21] : memref<64x16xf32, #tpu.memory_space<vmem>>, vector<8x16xf32>
    tpu.vector_store %arg7[%c56, %c0_21], %36 {strides = array<i32>} : memref<64x16xf32, #tpu.memory_space<vmem>>, vector<8x16xf32>,
    %38 = arith.truncf %33 : vector<8x32xf32> to vector<8x32xbf16>
    %c8_22 = arith.constant 8 : index
    %c0_23 = arith.constant 0 : index
    %39 = vector.load %arg5[%c8_22, %c0_23] : memref<64x128xf32, #tpu.memory_space<vmem>>, vector<8x128xf32>
    %cst_24 = arith.constant dense<0.000000e+00> : vector<8x128xf32>
    %40 = tpu.matmul %38, %1, %cst_24 {dimension_numbers = #tpu.dot_dimension_numbers<[1], [0], [0], [1], [0, 0, 1, 1], [], []>} : vector<8x32xbf16>, vector<32x128xbf16>, vector<8x128xf32> -> vector<8x128xf32>
    %41 = arith.addf %39, %40 : vector<8x128xf32>
    %42 = vector.extract_strided_slice %41 {offsets = [0, 0], sizes = [8, 96], strides = [1, 1]} : vector<8x128xf32> to vector<8x96xf32>
    %43 = arith.negf %42 : vector<8x96xf32>
    %44 = math.exp %43 : vector<8x96xf32>
    %cst_25 = arith.constant 1.000000e+00 : f32
    %45 = vector.broadcast %cst_25 : f32 to vector<8x96xf32>
    %46 = arith.addf %45, %44 : vector<8x96xf32>
    %47 = arith.divf %45, %46 : vector<8x96xf32>
    %48 = vector.extract_strided_slice %41 {offsets = [0, 96], sizes = [8, 32], strides = [1, 1]} : vector<8x128xf32> to vector<8x32xf32>
    %49 = math.tanh %48 : vector<8x32xf32>
    %50 = vector.extract_strided_slice %47 {offsets = [0, 32], sizes = [8, 32], strides = [1, 1]} : vector<8x96xf32> to vector<8x32xf32>
    %51 = arith.mulf %50, %30 : vector<8x32xf32>
    %52 = vector.extract_strided_slice %47 {offsets = [0, 0], sizes = [8, 32], strides = [1, 1]} : vector<8x96xf32> to vector<8x32xf32>
    %53 = arith.mulf %52, %49 : vector<8x32xf32>
    %54 = arith.addf %51, %53 : vector<8x32xf32>
    %55 = vector.extract_strided_slice %47 {offsets = [0, 64], sizes = [8, 32], strides = [1, 1]} : vector<8x96xf32> to vector<8x32xf32>
    %56 = math.tanh %54 : vector<8x32xf32>
    %57 = arith.mulf %55, %56 : vector<8x32xf32>
    %58 = vector.extract_strided_slice %57 {offsets = [0, 0], sizes = [8, 16], strides = [1, 1]} : vector<8x32xf32> to vector<8x16xf32>
    %c8_26 = arith.constant 8 : index
    %c0_27 = arith.constant 0 : index
    %59 = vector.load %arg6[%c8_26, %c0_27] : memref<64x16xf32, #tpu.memory_space<vmem>>, vector<8x16xf32>
    tpu.vector_store %arg6[%c8_26, %c0_27], %58 {strides = array<i32>} : memref<64x16xf32, #tpu.memory_space<vmem>>, vector<8x16xf32>,
    %60 = vector.extract_strided_slice %57 {offsets = [0, 16], sizes = [8, 16], strides = [1, 1]} : vector<8x32xf32> to vector<8x16xf32>
    %c48_28 = arith.constant 48 : index
    %c0_29 = arith.constant 0 : index
    %61 = vector.load %arg7[%c48_28, %c0_29] : memref<64x16xf32, #tpu.memory_space<vmem>>, vector<8x16xf32>
    tpu.vector_store %arg7[%c48_28, %c0_29], %60 {strides = array<i32>} : memref<64x16xf32, #tpu.memory_space<vmem>>, vector<8x16xf32>,
    %62 = arith.truncf %57 : vector<8x32xf32> to vector<8x32xbf16>
    %c16 = arith.constant 16 : index
    %c0_30 = arith.constant 0 : index
    %63 = vector.load %arg5[%c16, %c0_30] : memref<64x128xf32, #tpu.memory_space<vmem>>, vector<8x128xf32>
    %cst_31 = arith.constant dense<0.000000e+00> : vector<8x128xf32>
    %64 = tpu.matmul %62, %1, %cst_31 {dimension_numbers = #tpu.dot_dimension_numbers<[1], [0], [0], [1], [0, 0, 1, 1], [], []>} : vector<8x32xbf16>, vector<32x128xbf16>, vector<8x128xf32> -> vector<8x128xf32>
    %65 = arith.addf %63, %64 : vector<8x128xf32>
    %66 = vector.extract_strided_slice %65 {offsets = [0, 0], sizes = [8, 96], strides = [1, 1]} : vector<8x128xf32> to vector<8x96xf32>
    %67 = arith.negf %66 : vector<8x96xf32>
    %68 = math.exp %67 : vector<8x96xf32>
    %cst_32 = arith.constant 1.000000e+00 : f32
    %69 = vector.broadcast %cst_32 : f32 to vector<8x96xf32>
    %70 = arith.addf %69, %68 : vector<8x96xf32>
    %71 = arith.divf %69, %70 : vector<8x96xf32>
    %72 = vector.extract_strided_slice %65 {offsets = [0, 96], sizes = [8, 32], strides = [1, 1]} : vector<8x128xf32> to vector<8x32xf32>
    %73 = math.tanh %72 : vector<8x32xf32>
    %74 = vector.extract_strided_slice %71 {offsets = [0, 32], sizes = [8, 32], strides = [1, 1]} : vector<8x96xf32> to vector<8x32xf32>
    %75 = arith.mulf %74, %54 : vector<8x32xf32>
    %76 = vector.extract_strided_slice %71 {offsets = [0, 0], sizes = [8, 32], strides = [1, 1]} : vector<8x96xf32> to vector<8x32xf32>
    %77 = arith.mulf %76, %73 : vector<8x32xf32>
    %78 = arith.addf %75, %77 : vector<8x32xf32>
    %79 = vector.extract_strided_slice %71 {offsets = [0, 64], sizes = [8, 32], strides = [1, 1]} : vector<8x96xf32> to vector<8x32xf32>
    %80 = math.tanh %78 : vector<8x32xf32>
    %81 = arith.mulf %79, %80 : vector<8x32xf32>
    %82 = vector.extract_strided_slice %81 {offsets = [0, 0], sizes = [8, 16], strides = [1, 1]} : vector<8x32xf32> to vector<8x16xf32>
    %c16_33 = arith.constant 16 : index
    %c0_34 = arith.constant 0 : index
    %83 = vector.load %arg6[%c16_33, %c0_34] : memref<64x16xf32, #tpu.memory_space<vmem>>, vector<8x16xf32>
    tpu.vector_store %arg6[%c16_33, %c0_34], %82 {strides = array<i32>} : memref<64x16xf32, #tpu.memory_space<vmem>>, vector<8x16xf32>,
    %84 = vector.extract_strided_slice %81 {offsets = [0, 16], sizes = [8, 16], strides = [1, 1]} : vector<8x32xf32> to vector<8x16xf32>
    %c40_35 = arith.constant 40 : index
    %c0_36 = arith.constant 0 : index
    %85 = vector.load %arg7[%c40_35, %c0_36] : memref<64x16xf32, #tpu.memory_space<vmem>>, vector<8x16xf32>
    tpu.vector_store %arg7[%c40_35, %c0_36], %84 {strides = array<i32>} : memref<64x16xf32, #tpu.memory_space<vmem>>, vector<8x16xf32>,
    %86 = arith.truncf %81 : vector<8x32xf32> to vector<8x32xbf16>
    %c24_37 = arith.constant 24 : index
    %c0_38 = arith.constant 0 : index
    %87 = vector.load %arg5[%c24_37, %c0_38] : memref<64x128xf32, #tpu.memory_space<vmem>>, vector<8x128xf32>
    %cst_39 = arith.constant dense<0.000000e+00> : vector<8x128xf32>
    %88 = tpu.matmul %86, %1, %cst_39 {dimension_numbers = #tpu.dot_dimension_numbers<[1], [0], [0], [1], [0, 0, 1, 1], [], []>} : vector<8x32xbf16>, vector<32x128xbf16>, vector<8x128xf32> -> vector<8x128xf32>
    %89 = arith.addf %87, %88 : vector<8x128xf32>
    %90 = vector.extract_strided_slice %89 {offsets = [0, 0], sizes = [8, 96], strides = [1, 1]} : vector<8x128xf32> to vector<8x96xf32>
    %91 = arith.negf %90 : vector<8x96xf32>
    %92 = math.exp %91 : vector<8x96xf32>
    %cst_40 = arith.constant 1.000000e+00 : f32
    %93 = vector.broadcast %cst_40 : f32 to vector<8x96xf32>
    %94 = arith.addf %93, %92 : vector<8x96xf32>
    %95 = arith.divf %93, %94 : vector<8x96xf32>
    %96 = vector.extract_strided_slice %89 {offsets = [0, 96], sizes = [8, 32], strides = [1, 1]} : vector<8x128xf32> to vector<8x32xf32>
    %97 = math.tanh %96 : vector<8x32xf32>
    %98 = vector.extract_strided_slice %95 {offsets = [0, 32], sizes = [8, 32], strides = [1, 1]} : vector<8x96xf32> to vector<8x32xf32>
    %99 = arith.mulf %98, %78 : vector<8x32xf32>
    %100 = vector.extract_strided_slice %95 {offsets = [0, 0], sizes = [8, 32], strides = [1, 1]} : vector<8x96xf32> to vector<8x32xf32>
    %101 = arith.mulf %100, %97 : vector<8x32xf32>
    %102 = arith.addf %99, %101 : vector<8x32xf32>
    %103 = vector.extract_strided_slice %95 {offsets = [0, 64], sizes = [8, 32], strides = [1, 1]} : vector<8x96xf32> to vector<8x32xf32>
    %104 = math.tanh %102 : vector<8x32xf32>
    %105 = arith.mulf %103, %104 : vector<8x32xf32>
    %106 = vector.extract_strided_slice %105 {offsets = [0, 0], sizes = [8, 16], strides = [1, 1]} : vector<8x32xf32> to vector<8x16xf32>
    %c24_41 = arith.constant 24 : index
    %c0_42 = arith.constant 0 : index
    %107 = vector.load %arg6[%c24_41, %c0_42] : memref<64x16xf32, #tpu.memory_space<vmem>>, vector<8x16xf32>
    tpu.vector_store %arg6[%c24_41, %c0_42], %106 {strides = array<i32>} : memref<64x16xf32, #tpu.memory_space<vmem>>, vector<8x16xf32>,
    %108 = vector.extract_strided_slice %105 {offsets = [0, 16], sizes = [8, 16], strides = [1, 1]} : vector<8x32xf32> to vector<8x16xf32>
    %c32 = arith.constant 32 : index
    %c0_43 = arith.constant 0 : index
    %109 = vector.load %arg7[%c32, %c0_43] : memref<64x16xf32, #tpu.memory_space<vmem>>, vector<8x16xf32>
    tpu.vector_store %arg7[%c32, %c0_43], %108 {strides = array<i32>} : memref<64x16xf32, #tpu.memory_space<vmem>>, vector<8x16xf32>,
    %110 = arith.truncf %105 : vector<8x32xf32> to vector<8x32xbf16>
    %c32_44 = arith.constant 32 : index
    %c0_45 = arith.constant 0 : index
    %111 = vector.load %arg5[%c32_44, %c0_45] : memref<64x128xf32, #tpu.memory_space<vmem>>, vector<8x128xf32>
    %cst_46 = arith.constant dense<0.000000e+00> : vector<8x128xf32>
    %112 = tpu.matmul %110, %1, %cst_46 {dimension_numbers = #tpu.dot_dimension_numbers<[1], [0], [0], [1], [0, 0, 1, 1], [], []>} : vector<8x32xbf16>, vector<32x128xbf16>, vector<8x128xf32> -> vector<8x128xf32>
    %113 = arith.addf %111, %112 : vector<8x128xf32>
    %114 = vector.extract_strided_slice %113 {offsets = [0, 0], sizes = [8, 96], strides = [1, 1]} : vector<8x128xf32> to vector<8x96xf32>
    %115 = arith.negf %114 : vector<8x96xf32>
    %116 = math.exp %115 : vector<8x96xf32>
    %cst_47 = arith.constant 1.000000e+00 : f32
    %117 = vector.broadcast %cst_47 : f32 to vector<8x96xf32>
    %118 = arith.addf %117, %116 : vector<8x96xf32>
    %119 = arith.divf %117, %118 : vector<8x96xf32>
    %120 = vector.extract_strided_slice %113 {offsets = [0, 96], sizes = [8, 32], strides = [1, 1]} : vector<8x128xf32> to vector<8x32xf32>
    %121 = math.tanh %120 : vector<8x32xf32>
    %122 = vector.extract_strided_slice %119 {offsets = [0, 32], sizes = [8, 32], strides = [1, 1]} : vector<8x96xf32> to vector<8x32xf32>
    %123 = arith.mulf %122, %102 : vector<8x32xf32>
    %124 = vector.extract_strided_slice %119 {offsets = [0, 0], sizes = [8, 32], strides = [1, 1]} : vector<8x96xf32> to vector<8x32xf32>
    %125 = arith.mulf %124, %121 : vector<8x32xf32>
    %126 = arith.addf %123, %125 : vector<8x32xf32>
    %127 = vector.extract_strided_slice %119 {offsets = [0, 64], sizes = [8, 32], strides = [1, 1]} : vector<8x96xf32> to vector<8x32xf32>
    %128 = math.tanh %126 : vector<8x32xf32>
    %129 = arith.mulf %127, %128 : vector<8x32xf32>
    %130 = vector.extract_strided_slice %129 {offsets = [0, 0], sizes = [8, 16], strides = [1, 1]} : vector<8x32xf32> to vector<8x16xf32>
    %c32_48 = arith.constant 32 : index
    %c0_49 = arith.constant 0 : index
    %131 = vector.load %arg6[%c32_48, %c0_49] : memref<64x16xf32, #tpu.memory_space<vmem>>, vector<8x16xf32>
    tpu.vector_store %arg6[%c32_48, %c0_49], %130 {strides = array<i32>} : memref<64x16xf32, #tpu.memory_space<vmem>>, vector<8x16xf32>,
    %132 = vector.extract_strided_slice %129 {offsets = [0, 16], sizes = [8, 16], strides = [1, 1]} : vector<8x32xf32> to vector<8x16xf32>
    %c24_50 = arith.constant 24 : index
    %c0_51 = arith.constant 0 : index
    %133 = vector.load %arg7[%c24_50, %c0_51] : memref<64x16xf32, #tpu.memory_space<vmem>>, vector<8x16xf32>
    tpu.vector_store %arg7[%c24_50, %c0_51], %132 {strides = array<i32>} : memref<64x16xf32, #tpu.memory_space<vmem>>, vector<8x16xf32>,
    %134 = arith.truncf %129 : vector<8x32xf32> to vector<8x32xbf16>
    %c40_52 = arith.constant 40 : index
    %c0_53 = arith.constant 0 : index
    %135 = vector.load %arg5[%c40_52, %c0_53] : memref<64x128xf32, #tpu.memory_space<vmem>>, vector<8x128xf32>
    %cst_54 = arith.constant dense<0.000000e+00> : vector<8x128xf32>
    %136 = tpu.matmul %134, %1, %cst_54 {dimension_numbers = #tpu.dot_dimension_numbers<[1], [0], [0], [1], [0, 0, 1, 1], [], []>} : vector<8x32xbf16>, vector<32x128xbf16>, vector<8x128xf32> -> vector<8x128xf32>
    %137 = arith.addf %135, %136 : vector<8x128xf32>
    %138 = vector.extract_strided_slice %137 {offsets = [0, 0], sizes = [8, 96], strides = [1, 1]} : vector<8x128xf32> to vector<8x96xf32>
    %139 = arith.negf %138 : vector<8x96xf32>
    %140 = math.exp %139 : vector<8x96xf32>
    %cst_55 = arith.constant 1.000000e+00 : f32
    %141 = vector.broadcast %cst_55 : f32 to vector<8x96xf32>
    %142 = arith.addf %141, %140 : vector<8x96xf32>
    %143 = arith.divf %141, %142 : vector<8x96xf32>
    %144 = vector.extract_strided_slice %137 {offsets = [0, 96], sizes = [8, 32], strides = [1, 1]} : vector<8x128xf32> to vector<8x32xf32>
    %145 = math.tanh %144 : vector<8x32xf32>
    %146 = vector.extract_strided_slice %143 {offsets = [0, 32], sizes = [8, 32], strides = [1, 1]} : vector<8x96xf32> to vector<8x32xf32>
    %147 = arith.mulf %146, %126 : vector<8x32xf32>
    %148 = vector.extract_strided_slice %143 {offsets = [0, 0], sizes = [8, 32], strides = [1, 1]} : vector<8x96xf32> to vector<8x32xf32>
    %149 = arith.mulf %148, %145 : vector<8x32xf32>
    %150 = arith.addf %147, %149 : vector<8x32xf32>
    %151 = vector.extract_strided_slice %143 {offsets = [0, 64], sizes = [8, 32], strides = [1, 1]} : vector<8x96xf32> to vector<8x32xf32>
    %152 = math.tanh %150 : vector<8x32xf32>
    %153 = arith.mulf %151, %152 : vector<8x32xf32>
    %154 = vector.extract_strided_slice %153 {offsets = [0, 0], sizes = [8, 16], strides = [1, 1]} : vector<8x32xf32> to vector<8x16xf32>
    %c40_56 = arith.constant 40 : index
    %c0_57 = arith.constant 0 : index
    %155 = vector.load %arg6[%c40_56, %c0_57] : memref<64x16xf32, #tpu.memory_space<vmem>>, vector<8x16xf32>
    tpu.vector_store %arg6[%c40_56, %c0_57], %154 {strides = array<i32>} : memref<64x16xf32, #tpu.memory_space<vmem>>, vector<8x16xf32>,
    %156 = vector.extract_strided_slice %153 {offsets = [0, 16], sizes = [8, 16], strides = [1, 1]} : vector<8x32xf32> to vector<8x16xf32>
    %c16_58 = arith.constant 16 : index
    %c0_59 = arith.constant 0 : index
    %157 = vector.load %arg7[%c16_58, %c0_59] : memref<64x16xf32, #tpu.memory_space<vmem>>, vector<8x16xf32>
    tpu.vector_store %arg7[%c16_58, %c0_59], %156 {strides = array<i32>} : memref<64x16xf32, #tpu.memory_space<vmem>>, vector<8x16xf32>,
    %158 = arith.truncf %153 : vector<8x32xf32> to vector<8x32xbf16>
    %c48_60 = arith.constant 48 : index
    %c0_61 = arith.constant 0 : index
    %159 = vector.load %arg5[%c48_60, %c0_61] : memref<64x128xf32, #tpu.memory_space<vmem>>, vector<8x128xf32>
    %cst_62 = arith.constant dense<0.000000e+00> : vector<8x128xf32>
    %160 = tpu.matmul %158, %1, %cst_62 {dimension_numbers = #tpu.dot_dimension_numbers<[1], [0], [0], [1], [0, 0, 1, 1], [], []>} : vector<8x32xbf16>, vector<32x128xbf16>, vector<8x128xf32> -> vector<8x128xf32>
    %161 = arith.addf %159, %160 : vector<8x128xf32>
    %162 = vector.extract_strided_slice %161 {offsets = [0, 0], sizes = [8, 96], strides = [1, 1]} : vector<8x128xf32> to vector<8x96xf32>
    %163 = arith.negf %162 : vector<8x96xf32>
    %164 = math.exp %163 : vector<8x96xf32>
    %cst_63 = arith.constant 1.000000e+00 : f32
    %165 = vector.broadcast %cst_63 : f32 to vector<8x96xf32>
    %166 = arith.addf %165, %164 : vector<8x96xf32>
    %167 = arith.divf %165, %166 : vector<8x96xf32>
    %168 = vector.extract_strided_slice %161 {offsets = [0, 96], sizes = [8, 32], strides = [1, 1]} : vector<8x128xf32> to vector<8x32xf32>
    %169 = math.tanh %168 : vector<8x32xf32>
    %170 = vector.extract_strided_slice %167 {offsets = [0, 32], sizes = [8, 32], strides = [1, 1]} : vector<8x96xf32> to vector<8x32xf32>
    %171 = arith.mulf %170, %150 : vector<8x32xf32>
    %172 = vector.extract_strided_slice %167 {offsets = [0, 0], sizes = [8, 32], strides = [1, 1]} : vector<8x96xf32> to vector<8x32xf32>
    %173 = arith.mulf %172, %169 : vector<8x32xf32>
    %174 = arith.addf %171, %173 : vector<8x32xf32>
    %175 = vector.extract_strided_slice %167 {offsets = [0, 64], sizes = [8, 32], strides = [1, 1]} : vector<8x96xf32> to vector<8x32xf32>
    %176 = math.tanh %174 : vector<8x32xf32>
    %177 = arith.mulf %175, %176 : vector<8x32xf32>
    %178 = vector.extract_strided_slice %177 {offsets = [0, 0], sizes = [8, 16], strides = [1, 1]} : vector<8x32xf32> to vector<8x16xf32>
    %c48_64 = arith.constant 48 : index
    %c0_65 = arith.constant 0 : index
    %179 = vector.load %arg6[%c48_64, %c0_65] : memref<64x16xf32, #tpu.memory_space<vmem>>, vector<8x16xf32>
    tpu.vector_store %arg6[%c48_64, %c0_65], %178 {strides = array<i32>} : memref<64x16xf32, #tpu.memory_space<vmem>>, vector<8x16xf32>,
    %180 = vector.extract_strided_slice %177 {offsets = [0, 16], sizes = [8, 16], strides = [1, 1]} : vector<8x32xf32> to vector<8x16xf32>
    %c8_66 = arith.constant 8 : index
    %c0_67 = arith.constant 0 : index
    %181 = vector.load %arg7[%c8_66, %c0_67] : memref<64x16xf32, #tpu.memory_space<vmem>>, vector<8x16xf32>
    tpu.vector_store %arg7[%c8_66, %c0_67], %180 {strides = array<i32>} : memref<64x16xf32, #tpu.memory_space<vmem>>, vector<8x16xf32>,
    %182 = arith.truncf %177 : vector<8x32xf32> to vector<8x32xbf16>
    %c56_68 = arith.constant 56 : index
    %c0_69 = arith.constant 0 : index
    %183 = vector.load %arg5[%c56_68, %c0_69] : memref<64x128xf32, #tpu.memory_space<vmem>>, vector<8x128xf32>
    %cst_70 = arith.constant dense<0.000000e+00> : vector<8x128xf32>
    %184 = tpu.matmul %182, %1, %cst_70 {dimension_numbers = #tpu.dot_dimension_numbers<[1], [0], [0], [1], [0, 0, 1, 1], [], []>} : vector<8x32xbf16>, vector<32x128xbf16>, vector<8x128xf32> -> vector<8x128xf32>
    %185 = arith.addf %183, %184 : vector<8x128xf32>
    %186 = vector.extract_strided_slice %185 {offsets = [0, 0], sizes = [8, 96], strides = [1, 1]} : vector<8x128xf32> to vector<8x96xf32>
    %187 = arith.negf %186 : vector<8x96xf32>
    %188 = math.exp %187 : vector<8x96xf32>
    %cst_71 = arith.constant 1.000000e+00 : f32
    %189 = vector.broadcast %cst_71 : f32 to vector<8x96xf32>
    %190 = arith.addf %189, %188 : vector<8x96xf32>
    %191 = arith.divf %189, %190 : vector<8x96xf32>
    %192 = vector.extract_strided_slice %185 {offsets = [0, 96], sizes = [8, 32], strides = [1, 1]} : vector<8x128xf32> to vector<8x32xf32>
    %193 = math.tanh %192 : vector<8x32xf32>
    %194 = vector.extract_strided_slice %191 {offsets = [0, 32], sizes = [8, 32], strides = [1, 1]} : vector<8x96xf32> to vector<8x32xf32>
    %195 = arith.mulf %194, %174 : vector<8x32xf32>
    %196 = vector.extract_strided_slice %191 {offsets = [0, 0], sizes = [8, 32], strides = [1, 1]} : vector<8x96xf32> to vector<8x32xf32>
    %197 = arith.mulf %196, %193 : vector<8x32xf32>
    %198 = arith.addf %195, %197 : vector<8x32xf32>
    %199 = vector.extract_strided_slice %191 {offsets = [0, 64], sizes = [8, 32], strides = [1, 1]} : vector<8x96xf32> to vector<8x32xf32>
    %200 = math.tanh %198 : vector<8x32xf32>
    %201 = arith.mulf %199, %200 : vector<8x32xf32>
    %202 = vector.extract_strided_slice %201 {offsets = [0, 0], sizes = [8, 16], strides = [1, 1]} : vector<8x32xf32> to vector<8x16xf32>
    %c56_72 = arith.constant 56 : index
    %c0_73 = arith.constant 0 : index
    %203 = vector.load %arg6[%c56_72, %c0_73] : memref<64x16xf32, #tpu.memory_space<vmem>>, vector<8x16xf32>
    tpu.vector_store %arg6[%c56_72, %c0_73], %202 {strides = array<i32>} : memref<64x16xf32, #tpu.memory_space<vmem>>, vector<8x16xf32>,
    %204 = vector.extract_strided_slice %201 {offsets = [0, 16], sizes = [8, 16], strides = [1, 1]} : vector<8x32xf32> to vector<8x16xf32>
    %c0_74 = arith.constant 0 : index
    %c0_75 = arith.constant 0 : index
    %205 = vector.load %arg7[%c0_74, %c0_75] : memref<64x16xf32, #tpu.memory_space<vmem>>, vector<8x16xf32>
    tpu.vector_store %arg7[%c0_74, %c0_75], %204 {strides = array<i32>} : memref<64x16xf32, #tpu.memory_space<vmem>>, vector<8x16xf32>,
    %c0_76 = arith.constant 0 : index
    %c0_77 = arith.constant 0 : index
    %206 = vector.load %arg6[%c0_76, %c0_77] : memref<64x16xf32, #tpu.memory_space<vmem>>, vector<64x16xf32>
    %cst_78 = arith.constant dense<0.000000e+00> : vector<64x10xf32>
    %207 = tpu.matmul %206, %3, %cst_78 {dimension_numbers = #tpu.dot_dimension_numbers<[1], [0], [0], [1], [0, 0, 1, 1], [], []>} : vector<64x16xf32>, vector<16x10xf32>, vector<64x10xf32> -> vector<64x10xf32>
    %c0_79 = arith.constant 0 : index
    %c0_80 = arith.constant 0 : index
    %208 = vector.load %arg7[%c0_79, %c0_80] : memref<64x16xf32, #tpu.memory_space<vmem>>, vector<64x16xf32>
    %cst_81 = arith.constant dense<0.000000e+00> : vector<64x10xf32>
    %209 = tpu.matmul %208, %4, %cst_81 {dimension_numbers = #tpu.dot_dimension_numbers<[1], [0], [0], [1], [0, 0, 1, 1], [], []>} : vector<64x16xf32>, vector<16x10xf32>, vector<64x10xf32> -> vector<64x10xf32>
    %210 = arith.addf %207, %209 : vector<64x10xf32>
    %211 = vector.broadcast %5 : vector<1x10xf32> to vector<64x10xf32>
    %212 = arith.addf %210, %211 : vector<64x10xf32>
    %c0_82 = arith.constant 0 : index
    %c0_83 = arith.constant 0 : index
    %213 = vector.load %arg8[%c0_82, %c0_83] : memref<64x10xf32, #tpu.memory_space<vmem>>, vector<64x10xf32>
    tpu.vector_store %arg8[%c0_82, %c0_83], %212 {strides = array<i32>} : memref<64x10xf32, #tpu.memory_space<vmem>>, vector<64x10xf32>,
    %214 = tpu.iota {dimensions = array<i32: 1>} : vector<8x10xi32>
    %c8_i32 = arith.constant 8 : i32
    %215 = vector.broadcast %c8_i32 : i32 to vector<8x10xi32>
    %216 = arith.cmpi eq, %214, %215 : vector<8x10xi32>
    %cst_84 = arith.constant 0.000000e+00 : f32
    %cst_85 = arith.constant -1.000000e+04 : f32
    %217 = vector.broadcast %cst_84 : f32 to vector<8x10xf32>
    %218 = vector.broadcast %cst_85 : f32 to vector<8x10xf32>
    %219 = arith.select %216, %217, %218 : vector<8x10xi1>, vector<8x10xf32>
    %c0_86 = arith.constant 0 : index
    %c0_87 = arith.constant 0 : index
    %220 = vector.load %arg8[%c0_86, %c0_87] : memref<64x10xf32, #tpu.memory_space<vmem>>, vector<8x10xf32>
    %cst_88 = arith.constant dense<0xFF800000> : vector<8xf32>
    %221 = vector.multi_reduction <maximumf>, %219, %cst_88 [1] : vector<8x10xf32> to vector<8xf32>
    %222 = vector.shape_cast %221 : vector<8xf32> to vector<8x1xf32>
    %223 = vector.broadcast %222 : vector<8x1xf32> to vector<8x10xf32>
    %224 = arith.subf %219, %223 : vector<8x10xf32>
    %225 = math.exp %224 : vector<8x10xf32>
    %cst_89 = arith.constant dense<0.000000e+00> : vector<8x10xf32>
    %226 = tpu.matmul %225, %7, %cst_89 {dimension_numbers = #tpu.dot_dimension_numbers<[1], [0], [0], [1], [0, 0, 1, 1], [], []>} : vector<8x10xf32>, vector<10x10xf32>, vector<8x10xf32> -> vector<8x10xf32>
    %227 = vector.broadcast %222 : vector<8x1xf32> to vector<8x10xf32>
    %228 = arith.addf %220, %227 : vector<8x10xf32>
    %229 = math.log %226 : vector<8x10xf32>
    %230 = arith.addf %228, %229 : vector<8x10xf32>
    %c8_90 = arith.constant 8 : index
    %c0_91 = arith.constant 0 : index
    %231 = vector.load %arg8[%c8_90, %c0_91] : memref<64x10xf32, #tpu.memory_space<vmem>>, vector<8x10xf32>
    %cst_92 = arith.constant dense<0xFF800000> : vector<8xf32>
    %232 = vector.multi_reduction <maximumf>, %230, %cst_92 [1] : vector<8x10xf32> to vector<8xf32>
    %233 = vector.shape_cast %232 : vector<8xf32> to vector<8x1xf32>
    %234 = vector.broadcast %233 : vector<8x1xf32> to vector<8x10xf32>
    %235 = arith.subf %230, %234 : vector<8x10xf32>
    %236 = math.exp %235 : vector<8x10xf32>
    %cst_93 = arith.constant dense<0.000000e+00> : vector<8x10xf32>
    %237 = tpu.matmul %236, %7, %cst_93 {dimension_numbers = #tpu.dot_dimension_numbers<[1], [0], [0], [1], [0, 0, 1, 1], [], []>} : vector<8x10xf32>, vector<10x10xf32>, vector<8x10xf32> -> vector<8x10xf32>
    %238 = vector.broadcast %233 : vector<8x1xf32> to vector<8x10xf32>
    %239 = arith.addf %231, %238 : vector<8x10xf32>
    %240 = math.log %237 : vector<8x10xf32>
    %241 = arith.addf %239, %240 : vector<8x10xf32>
    %c16_94 = arith.constant 16 : index
    %c0_95 = arith.constant 0 : index
    %242 = vector.load %arg8[%c16_94, %c0_95] : memref<64x10xf32, #tpu.memory_space<vmem>>, vector<8x10xf32>
    %cst_96 = arith.constant dense<0xFF800000> : vector<8xf32>
    %243 = vector.multi_reduction <maximumf>, %241, %cst_96 [1] : vector<8x10xf32> to vector<8xf32>
    %244 = vector.shape_cast %243 : vector<8xf32> to vector<8x1xf32>
    %245 = vector.broadcast %244 : vector<8x1xf32> to vector<8x10xf32>
    %246 = arith.subf %241, %245 : vector<8x10xf32>
    %247 = math.exp %246 : vector<8x10xf32>
    %cst_97 = arith.constant dense<0.000000e+00> : vector<8x10xf32>
    %248 = tpu.matmul %247, %7, %cst_97 {dimension_numbers = #tpu.dot_dimension_numbers<[1], [0], [0], [1], [0, 0, 1, 1], [], []>} : vector<8x10xf32>, vector<10x10xf32>, vector<8x10xf32> -> vector<8x10xf32>
    %249 = vector.broadcast %244 : vector<8x1xf32> to vector<8x10xf32>
    %250 = arith.addf %242, %249 : vector<8x10xf32>
    %251 = math.log %248 : vector<8x10xf32>
    %252 = arith.addf %250, %251 : vector<8x10xf32>
    %c24_98 = arith.constant 24 : index
    %c0_99 = arith.constant 0 : index
    %253 = vector.load %arg8[%c24_98, %c0_99] : memref<64x10xf32, #tpu.memory_space<vmem>>, vector<8x10xf32>
    %cst_100 = arith.constant dense<0xFF800000> : vector<8xf32>
    %254 = vector.multi_reduction <maximumf>, %252, %cst_100 [1] : vector<8x10xf32> to vector<8xf32>
    %255 = vector.shape_cast %254 : vector<8xf32> to vector<8x1xf32>
    %256 = vector.broadcast %255 : vector<8x1xf32> to vector<8x10xf32>
    %257 = arith.subf %252, %256 : vector<8x10xf32>
    %258 = math.exp %257 : vector<8x10xf32>
    %cst_101 = arith.constant dense<0.000000e+00> : vector<8x10xf32>
    %259 = tpu.matmul %258, %7, %cst_101 {dimension_numbers = #tpu.dot_dimension_numbers<[1], [0], [0], [1], [0, 0, 1, 1], [], []>} : vector<8x10xf32>, vector<10x10xf32>, vector<8x10xf32> -> vector<8x10xf32>
    %260 = vector.broadcast %255 : vector<8x1xf32> to vector<8x10xf32>
    %261 = arith.addf %253, %260 : vector<8x10xf32>
    %262 = math.log %259 : vector<8x10xf32>
    %263 = arith.addf %261, %262 : vector<8x10xf32>
    %c32_102 = arith.constant 32 : index
    %c0_103 = arith.constant 0 : index
    %264 = vector.load %arg8[%c32_102, %c0_103] : memref<64x10xf32, #tpu.memory_space<vmem>>, vector<8x10xf32>
    %cst_104 = arith.constant dense<0xFF800000> : vector<8xf32>
    %265 = vector.multi_reduction <maximumf>, %263, %cst_104 [1] : vector<8x10xf32> to vector<8xf32>
    %266 = vector.shape_cast %265 : vector<8xf32> to vector<8x1xf32>
    %267 = vector.broadcast %266 : vector<8x1xf32> to vector<8x10xf32>
    %268 = arith.subf %263, %267 : vector<8x10xf32>
    %269 = math.exp %268 : vector<8x10xf32>
    %cst_105 = arith.constant dense<0.000000e+00> : vector<8x10xf32>
    %270 = tpu.matmul %269, %7, %cst_105 {dimension_numbers = #tpu.dot_dimension_numbers<[1], [0], [0], [1], [0, 0, 1, 1], [], []>} : vector<8x10xf32>, vector<10x10xf32>, vector<8x10xf32> -> vector<8x10xf32>
    %271 = vector.broadcast %266 : vector<8x1xf32> to vector<8x10xf32>
    %272 = arith.addf %264, %271 : vector<8x10xf32>
    %273 = math.log %270 : vector<8x10xf32>
    %274 = arith.addf %272, %273 : vector<8x10xf32>
    %c40_106 = arith.constant 40 : index
    %c0_107 = arith.constant 0 : index
    %275 = vector.load %arg8[%c40_106, %c0_107] : memref<64x10xf32, #tpu.memory_space<vmem>>, vector<8x10xf32>
    %cst_108 = arith.constant dense<0xFF800000> : vector<8xf32>
    %276 = vector.multi_reduction <maximumf>, %274, %cst_108 [1] : vector<8x10xf32> to vector<8xf32>
    %277 = vector.shape_cast %276 : vector<8xf32> to vector<8x1xf32>
    %278 = vector.broadcast %277 : vector<8x1xf32> to vector<8x10xf32>
    %279 = arith.subf %274, %278 : vector<8x10xf32>
    %280 = math.exp %279 : vector<8x10xf32>
    %cst_109 = arith.constant dense<0.000000e+00> : vector<8x10xf32>
    %281 = tpu.matmul %280, %7, %cst_109 {dimension_numbers = #tpu.dot_dimension_numbers<[1], [0], [0], [1], [0, 0, 1, 1], [], []>} : vector<8x10xf32>, vector<10x10xf32>, vector<8x10xf32> -> vector<8x10xf32>
    %282 = vector.broadcast %277 : vector<8x1xf32> to vector<8x10xf32>
    %283 = arith.addf %275, %282 : vector<8x10xf32>
    %284 = math.log %281 : vector<8x10xf32>
    %285 = arith.addf %283, %284 : vector<8x10xf32>
    %c48_110 = arith.constant 48 : index
    %c0_111 = arith.constant 0 : index
    %286 = vector.load %arg8[%c48_110, %c0_111] : memref<64x10xf32, #tpu.memory_space<vmem>>, vector<8x10xf32>
    %cst_112 = arith.constant dense<0xFF800000> : vector<8xf32>
    %287 = vector.multi_reduction <maximumf>, %285, %cst_112 [1] : vector<8x10xf32> to vector<8xf32>
    %288 = vector.shape_cast %287 : vector<8xf32> to vector<8x1xf32>
    %289 = vector.broadcast %288 : vector<8x1xf32> to vector<8x10xf32>
    %290 = arith.subf %285, %289 : vector<8x10xf32>
    %291 = math.exp %290 : vector<8x10xf32>
    %cst_113 = arith.constant dense<0.000000e+00> : vector<8x10xf32>
    %292 = tpu.matmul %291, %7, %cst_113 {dimension_numbers = #tpu.dot_dimension_numbers<[1], [0], [0], [1], [0, 0, 1, 1], [], []>} : vector<8x10xf32>, vector<10x10xf32>, vector<8x10xf32> -> vector<8x10xf32>
    %293 = vector.broadcast %288 : vector<8x1xf32> to vector<8x10xf32>
    %294 = arith.addf %286, %293 : vector<8x10xf32>
    %295 = math.log %292 : vector<8x10xf32>
    %296 = arith.addf %294, %295 : vector<8x10xf32>
    %c56_114 = arith.constant 56 : index
    %c0_115 = arith.constant 0 : index
    %297 = vector.load %arg8[%c56_114, %c0_115] : memref<64x10xf32, #tpu.memory_space<vmem>>, vector<8x10xf32>
    %cst_116 = arith.constant dense<0xFF800000> : vector<8xf32>
    %298 = vector.multi_reduction <maximumf>, %296, %cst_116 [1] : vector<8x10xf32> to vector<8xf32>
    %299 = vector.shape_cast %298 : vector<8xf32> to vector<8x1xf32>
    %300 = vector.broadcast %299 : vector<8x1xf32> to vector<8x10xf32>
    %301 = arith.subf %296, %300 : vector<8x10xf32>
    %302 = math.exp %301 : vector<8x10xf32>
    %cst_117 = arith.constant dense<0.000000e+00> : vector<8x10xf32>
    %303 = tpu.matmul %302, %7, %cst_117 {dimension_numbers = #tpu.dot_dimension_numbers<[1], [0], [0], [1], [0, 0, 1, 1], [], []>} : vector<8x10xf32>, vector<10x10xf32>, vector<8x10xf32> -> vector<8x10xf32>
    %304 = vector.broadcast %299 : vector<8x1xf32> to vector<8x10xf32>
    %305 = arith.addf %297, %304 : vector<8x10xf32>
    %306 = math.log %303 : vector<8x10xf32>
    %307 = arith.addf %305, %306 : vector<8x10xf32>
    %308 = vector.extract_strided_slice %6 {offsets = [9, 0], sizes = [1, 10], strides = [1, 1]} : vector<10x10xf32> to vector<1x10xf32>
    %309 = vector.broadcast %308 : vector<1x10xf32> to vector<8x10xf32>
    %310 = arith.addf %307, %309 : vector<8x10xf32>
    %cst_118 = arith.constant dense<0xFF800000> : vector<8xf32>
    %311 = vector.multi_reduction <maximumf>, %310, %cst_118 [1] : vector<8x10xf32> to vector<8xf32>
    %312 = vector.shape_cast %311 : vector<8xf32> to vector<8x1xf32>
    %313 = vector.broadcast %312 : vector<8x1xf32> to vector<8x10xf32>
    %314 = arith.subf %310, %313 : vector<8x10xf32>
    %315 = math.exp %314 : vector<8x10xf32>
    %cst_119 = arith.constant dense<0.000000e+00> : vector<8xf32>
    %316 = vector.multi_reduction <add>, %315, %cst_119 [1] : vector<8x10xf32> to vector<8xf32>
    %317 = vector.shape_cast %316 : vector<8xf32> to vector<8x1xf32>
    %318 = math.log %317 : vector<8x1xf32>
    %319 = arith.addf %312, %318 : vector<8x1xf32>
    %320 = tpu.iota {dimensions = array<i32: 0>} : vector<8x1xi32>
    %c2_i32 = arith.constant 2 : i32
    %321 = vector.broadcast %c2_i32 : i32 to vector<8x1xi32>
    %322 = arith.cmpi slt, %320, %321 : vector<8x1xi32>
    %cst_120 = arith.constant 0.000000e+00 : f32
    %323 = vector.broadcast %cst_120 : f32 to vector<8x1xf32>
    %324 = arith.select %322, %319, %323 : vector<8x1xi1>, vector<8x1xf32>
    %325 = vector.shape_cast %324 : vector<8x1xf32> to vector<1x8x1xf32>
    %cst_121 = arith.constant dense<0.000000e+00> : vector<1xf32>
    %326 = vector.multi_reduction <add>, %325, %cst_121 [1, 2] : vector<1x8x1xf32> to vector<1xf32>
    %327 = vector.shape_cast %326 : vector<1xf32> to vector<1x1x1xf32>
    %328 = vector.extract %327[0, 0, 0] : f32 from vector<1x1x1xf32>
    %329 = vector.broadcast %328 : f32 to vector<1x1xf32>
    %330 = tpu.iota {dimensions = array<i32: 1>} : vector<64x10xi32>
    %c0_122 = arith.constant 0 : index
    %c0_123 = arith.constant 0 : index
    %331 = vector.load %arg3[%c0_122, %c0_123] : memref<64x2xi32, #tpu.memory_space<vmem>>, vector<64x2xi32>
    %332 = vector.extract_strided_slice %331 {offsets = [0, 0], sizes = [64, 1], strides = [1, 1]} : vector<64x2xi32> to vector<64x1xi32>
    %333 = vector.broadcast %332 : vector<64x1xi32> to vector<64x10xi32>
    %334 = arith.cmpi eq, %333, %330 : vector<64x10xi32>
    %335 = arith.extui %334 : vector<64x10xi1> to vector<64x10xi32>
    %336 = arith.sitofp %335 : vector<64x10xi32> to vector<64x10xf32>
    %337 = vector.extract_strided_slice %331 {offsets = [0, 1], sizes = [64, 1], strides = [1, 1]} : vector<64x2xi32> to vector<64x1xi32>
    %338 = vector.broadcast %337 : vector<64x1xi32> to vector<64x10xi32>
    %339 = arith.cmpi eq, %338, %330 : vector<64x10xi32>
    %340 = arith.extui %339 : vector<64x10xi1> to vector<64x10xi32>
    %341 = arith.sitofp %340 : vector<64x10xi32> to vector<64x10xf32>
    %342 = arith.mulf %212, %336 : vector<64x10xf32>
    %343 = vector.shape_cast %342 : vector<64x10xf32> to vector<1x64x10xf32>
    %cst_124 = arith.constant dense<0.000000e+00> : vector<1xf32>
    %344 = vector.multi_reduction <add>, %343, %cst_124 [1, 2] : vector<1x64x10xf32> to vector<1xf32>
    %345 = vector.shape_cast %344 : vector<1xf32> to vector<1x1x1xf32>
    %346 = vector.extract %345[0, 0, 0] : f32 from vector<1x1x1xf32>
    %347 = vector.broadcast %346 : f32 to vector<1x1xf32>
    %cst_125 = arith.constant dense<0.000000e+00> : vector<64x10xf32>
    %348 = tpu.matmul %336, %6, %cst_125 {dimension_numbers = #tpu.dot_dimension_numbers<[1], [0], [0], [1], [0, 0, 1, 1], [], []>} : vector<64x10xf32>, vector<10x10xf32>, vector<64x10xf32> -> vector<64x10xf32>
    %349 = arith.mulf %348, %341 : vector<64x10xf32>
    %350 = vector.shape_cast %349 : vector<64x10xf32> to vector<1x64x10xf32>
    %cst_126 = arith.constant dense<0.000000e+00> : vector<1xf32>
    %351 = vector.multi_reduction <add>, %350, %cst_126 [1, 2] : vector<1x64x10xf32> to vector<1xf32>
    %352 = vector.shape_cast %351 : vector<1xf32> to vector<1x1x1xf32>
    %353 = vector.extract %352[0, 0, 0] : f32 from vector<1x1x1xf32>
    %354 = vector.broadcast %353 : f32 to vector<1x1xf32>
    %355 = vector.extract_strided_slice %336 {offsets = [56, 0], sizes = [8, 10], strides = [1, 1]} : vector<64x10xf32> to vector<8x10xf32>
    %356 = vector.broadcast %308 : vector<1x10xf32> to vector<8x10xf32>
    %357 = arith.mulf %356, %355 : vector<8x10xf32>
    %358 = vector.shape_cast %357 : vector<8x10xf32> to vector<1x8x10xf32>
    %cst_127 = arith.constant dense<0.000000e+00> : vector<1xf32>
    %359 = vector.multi_reduction <add>, %358, %cst_127 [1, 2] : vector<1x8x10xf32> to vector<1xf32>
    %360 = vector.shape_cast %359 : vector<1xf32> to vector<1x1x1xf32>
    %361 = vector.extract %360[0, 0, 0] : f32 from vector<1x1x1xf32>
    %362 = vector.broadcast %361 : f32 to vector<1x1xf32>
    %363 = arith.subf %329, %347 : vector<1x1xf32>
    %364 = arith.subf %363, %354 : vector<1x1xf32>
    %365 = arith.subf %364, %362 : vector<1x1xf32>
    %cst_128 = arith.constant 2.000000e+00 : f32
    %366 = vector.broadcast %cst_128 : f32 to vector<1x1xf32>
    %367 = arith.divf %365, %366 : vector<1x1xf32>
    %c0_129 = arith.constant 0 : index
    %c0_130 = arith.constant 0 : index
    %368 = vector.load %arg4[%c0_129, %c0_130] : memref<1x1xf32, #tpu.memory_space<vmem>>, vector<1x1xf32>
    tpu.vector_store %arg4[%c0_129, %c0_130], %367 {strides = array<i32>} : memref<1x1xf32, #tpu.memory_space<vmem>>, vector<1x1xf32>,
    return
  }
}

</mosaic_0001>

<bundles_post_ra>
// kernel: lstm_crf_forward.1
= control target key start
LH: loop header
LB: loop body
LE: loop exit
PB: predicated region body
PF: predicated region fallthrough
CT: control target
= control target key end

     0   :  { %v2854_v2 = vmov 0.0   ;;  %vm2855_vm0 = vmmov 0   ;;  %v2856_v5 = vmov 0   ;;  %s3480_s0 = inlined_call_operand.vmem [shape: bf16[64,256], index: 0, kind: input, shape index: {}]   ;;  %s3481_s1 = inlined_call_operand.vmem [shape: bf16[288,128], index: 1, kind: input, shape index: {}]   ;;  %s3482_s2 = inlined_call_operand.vmem [shape: f32[80,128], index: 2, kind: input, shape index: {}]   ;;  %s3483_s3 = inlined_call_operand.vmem [shape: s32[64,2], index: 3, kind: input, shape index: {}]   ;;  %s3484_s4 = inlined_call_operand.hbm [shape: f32[1,1], index: 4, kind: output, shape index: {}]  }
   0x1   :  { %v2702_v0 = vld [vmem:[%s3481_s1 + $0x78] sm:$0xff]   ;;  %2513 = vmatprep.subr.bf16.mxu1 %v2854_v2  ;;  %v2704_v3 = vld [vmem:[%s3481_s1 + $0x70] sm:$0xff]   ;;  %2517 = vmatprep.mubr.msk.bf16.mxu1 %vm2855_vm0, %v2854_v2  ;;  %v2706_v6 = vld [vmem:[%s3481_s1 + $0x68] sm:$0xff]  }
   0x2   :  { %v2703_v1 = vld [vmem:[%s3481_s1 + $0x38] sm:$0xff]   ;;  %2395 = vmatprep.subr.bf16.mxu0 %v2702_v0  ;;  %v2705_v4 = vld [vmem:[%s3481_s1 + $0x30] sm:$0xff]   ;;  %2698 = vset.pattern.permute.xlu1 %v2856_v5  ;;  %v2707_v7 = vld [vmem:[%s3481_s1 + $0x28] sm:$0xff]  }
   0x3   :  { %2396 = vmatpush3.bf16.msra.mxu0 %v2703_v1  ;;  %2699 = vset.pattern.permute.xlu0 %v2856_v5  ;;  %v2708_v8 = vld [vmem:[%s3481_s1 + $0x60] sm:$0xff]   ;;  %v2710_v10 = vld [vmem:[%s3481_s1 + $0x58] sm:$0xff]   ;;  %v2921_v11 = vld [vmem:[%s3481_s1 + $0x88] sm:$0xff]  }
   0x4   :  { %2397 = vmatprep.subr.bf16.mxu0 %v2704_v3  ;;  %v2709_v9 = vld [vmem:[%s3481_s1 + $0x20] sm:$0xff]   ;;  %v2711_v12 = vld [vmem:[%s3481_s1 + $0x18] sm:$0xff]   ;;  %v2712_v13 = vld [vmem:[%s3481_s1 + $0x50] sm:$0xff]   ;;  %2514 = vmatpush3.bf16.msra.mxu1 %v2921_v11 }
   0x5   :  { %v2713_v14 = vld [vmem:[%s3481_s1 + $0x10] sm:$0xff]   ;;  %2515 = vmatprep.subr.bf16.mxu1 %v2854_v2  ;;  %v2937_v15 = vld [vmem:[%s3481_s1 + $0x80] sm:$0xff]   ;;  %v2714_v16 = vld [vmem:[%s3481_s1 + $0x48] sm:$0xff]  }
   0x6   :  { %v2722_v17 = vld [vmem:[%s3480_s0 + $0x4] ss:$8 sps:$4 sm:$0xff]  }
   0x7   :  { %2398 = vmatpush3.bf16.msra.mxu0 %v2705_v4  ;;  %245 = vmatprep.mubr.bf16.mxu0 %v2722_v17 }
   0x8   :  { %2399 = vmatprep.subr.bf16.mxu0 %v2706_v6  ;;  %2516 = vmatpush3.bf16.msra.mxu1 %v2937_v15 }
   0x9   :  { %2521 = vmatprep.subr.bf16.mxu1 %v2854_v2 }
   0xb   :  { %2400 = vmatpush3.bf16.msra.mxu0 %v2707_v7 }
   0xc   :  { %2401 = vmatprep.subr.bf16.mxu0 %v2708_v8 }
   0xf   :  { %2402 = vmatpush3.bf16.msra.mxu0 %v2709_v9 }
  0x10   :  { %2403 = vmatprep.subr.bf16.mxu0 %v2710_v10 }
  0x13   :  { %2404 = vmatpush3.bf16.msra.mxu0 %v2711_v12 }
  0x14   :  { %2405 = vmatprep.subr.bf16.mxu0 %v2712_v13 }
  0x15   :  { %9 = vsyncpa [#allocation7], 0  ;;  %v2715_v18 = vld [vmem:[%s3481_s1 + $0x8] sm:$0xff]   ;;  %2518 = vmatmul.mubr.bf16.vlgmr.msra.gmra.mxu1 %v2856_v5  ;;  %v2717_v19 = vld [vmem:[%s3481_s1 + $0x40] sm:$0xff]   ;;  %s2858_s5 = smov 64   ;;  %vm299_vm1 = vcmask 261120  }
  0x16   :  { %2522 = vmatpush3.bf16.msra.mxu1 %v2921_v11  ;;  %2525 = vmatprep.mubr.msk.bf16.mxu1 %vm2855_vm0, %v2854_v2  ;;  %v2718_v20 = vld [vmem:[%s3481_s1] sm:$0xff]   ;;  %s2857_s1 = smov 32   ;;  %v2723_v3 = vld [vmem:[%s3480_s0 + $0x14] ss:$8 sps:$4 sm:$0xff]   ;;  %v2725_v4 = vld [vmem:[%s3480_s0 + $0x10] ss:$8 sps:$4 sm:$0xff]  }
  0x17   :  { %2406 = vmatpush3.bf16.msra.mxu0 %v2713_v14  ;;  %2523 = vmatprep.subr.bf16.mxu1 %v2854_v2  ;;  %v2720_v21 = vld [vmem:[%s3480_s0] ss:$8 sps:$4 sm:$0xff]   ;;  %vm1238_vm3 = vcmask 80896   ;;  %vm372_vm4 = vcmask 130048   ;;  %vm1261_vm5 = vcmask 1041408   ;;  %s2862_s26 = smov [#allocation6]  }
  0x18   :  { %2407 = vmatprep.subr.bf16.mxu0 %v2714_v16  ;;  %v2968_v27 = vld [vmem:[%s3482_s2] ss:$0 sm:$0xff]  ;;  %s2287_s27 = sshll.u32 %s2862_s26, 4  ;;  %s2288_s27 = int_to_ptr.vmem [resolvable:$true] %s2287_s27 }
  0x19   :  { %s2832_s28 = scalar_lea.vmem %s2288_s27, 16  ;;  %s2836_s29 = scalar_lea.vmem %s2288_s27, 32 }
  0x1a   :  { %2524 = vmatpush3.bf16.msra.mxu1 %v2937_v15  ;;  %p2833_p0 = scmp.ne.s32.totalorder %s2288_s27, %s2832_s28  ;;  %p2837_p1 = scmp.lt.s32.totalorder %s2288_s27, %s2288_s27 }
  0x1b   :  { %2408 = vmatpush3.bf16.msra.mxu0 %v2715_v18  ;;  %2529 = vmatprep.subr.bf16.mxu1 %v2854_v2  ;;  %p2838_p2 = scmp.lt.s32.totalorder %s2836_s29, %s2832_s28 }
  0x1c   :  { %2409 = vmatprep.subr.bf16.mxu0 %v2717_v19 }
  0x1d   :  { %p2839_p3 = por %p2838_p2, %p2837_p1 }
  0x1f   :  { %2410 = vmatpush3.bf16.msra.mxu0 %v2718_v20  ;;  %p2840_p4 = pnand %p2839_p3, %p2833_p0 }
  0x22   :  { %246 = vmatmul.mubr.bf16.vlgmr.msra.gmra.mxu0 %v2720_v21 }
  0x23   :  { %253 = vmatprep.mubr.bf16.mxu0 %v2723_v3 }
  0x2a   :  { %254 = vmatmul.mubr.bf16.gmra.mxu0 %v2725_v4 }
  0xd5   :  { %v337_v22 = vpop.f32.mrf.mxu1 }
  0xd7   :  { %v2519_v23 = vpop.f32.mrf.mxu1 }
  0xd9   :  { %v340_v24 = vpop.f32.mrf.mxu1 }
  0xdb   :  { %v2520_v25 = vpop.f32.mrf.mxu1 }
  0xe2   :  { %v2411_v26 = vpop.f32.mrf.mxu0 }
  0xe4   :  { %v2412_v28 = vpop.f32.mrf.mxu0 }
  0xe5   :  { %v2413_v29 = vadd.f32 %v2412_v28, %v2411_v26 }
  0xe6   :  { %v2414_v47 = vpop.f32.mrf.mxu0 }
  0xe7   :  { %v248_v30 = vadd.f32 %v2413_v29, %v2968_v27 }
  0xe8   :  { %v2415_v48 = vpop.f32.mrf.mxu0 }
  0xe9   :  { %v343_v31 = vadd.f32 %v337_v22, %v248_v30  ;;  %v2416_v49 = vadd.f32 %v2415_v48, %v2414_v47 }
  0xea   :  { %v2417_v10 = vpop.f32.mrf.mxu0 }
  0xeb   :  { %2732 = vtanh.f32 %v343_v31  ;;  %v2322_v33 = vmul.f32 -1.442695, %v343_v31  ;;  %v251_v50 = vadd.f32 %v2416_v49, %v2968_v27 }
  0xec   :  { %v2418_v12 = vpop.f32.mrf.mxu0 }
  0xed   :  { %2734 = vpow2.f32 %v2322_v33  ;;  %v2419_v13 = vadd.f32 %v2418_v12, %v2417_v10 }
  0xef   :  { %v256_v14 = vadd.f32 %v2419_v13, %v2968_v27 }
  0xf8   :  { %v2733_v32 = vpop.eup %2732 }
  0xf9   :  { %353 = vrot.lane.b32.xlu0 %v2733_v32, %s2857_s1 }
  0xfa   :  { %v2735_v34 = vpop.eup %2734 }
  0xfb   :  { %v347_v35 = vadd.f32 1.0, %v2735_v34 }
  0xfd   :  { %2736 = vrcp.f32 %v347_v35 }
 0x10a   :  { %v2737_v36 = vpop.eup %2736 }
 0x10b   :  { %v351_v39 = vmul.f32 0.0, %v2737_v36 }
 0x16b   :  { %v354_v37 = vpop.permute.xlu0 %353 }
 0x16c   :  { %v356_v38 = vmul.f32 %v2737_v36, %v354_v37  ;;  %v2420_v37 = vpop.f32.mrf.mxu0 }
 0x16e   :  { %358 = vrot.lane.b32.xlu0 %v356_v38, %s2857_s1  ;;  %v2421_v38 = vpop.f32.mrf.mxu0 }
 0x1e0   :  { %v359_v40 = vpop.permute.xlu0 %358 }
 0x1e1   :  { %v361_v41 = vadd.f32 %v359_v40, %v351_v39  ;;  %v2422_v39 = vadd.f32 %v2421_v38, %v2420_v37 }
 0x1e3   :  { %2738 = vtanh.f32 %v361_v41  ;;  %v259_v40 = vadd.f32 %v2422_v39, %v2968_v27 }
 0x1f0   :  { %v2739_v42 = vpop.eup %2738 }
 0x1f1   :  { %364 = vrot.lane.b32.xlu1 %v2739_v42, %s2857_s1 }
 0x263   :  { %v365_v43 = vpop.permute.xlu1 %364 }
 0x264   :  { %v2974_v44 = vmul.f32 %v2737_v36, %v365_v43 }
 0x266   :  { %v378_v45 = vpack.c.bf16 %v2974_v44, %v2974_v44 }
 0x268   :  { %381 = vrot.lane.b32.xlu1 %v378_v45, %s2858_s5 }
 0x2da   :  { %v382_v46 = vpop.permute.xlu1 %381 }
 0x2db   :  { %2526 = vmatmul.mubr.msk.bf16.vlgmr.msra.gmra.mxu1 %vm299_vm1, %v382_v46 }
 0x2dc   :  { %2530 = vmatpush3.bf16.msra.mxu1 %v2921_v11  ;;  %2533 = vmatprep.mubr.msk.bf16.mxu1 %vm2855_vm0, %v2854_v2 }
 0x2dd   :  { %2531 = vmatprep.subr.bf16.mxu1 %v2854_v2 }
 0x2e0   :  { %2532 = vmatpush3.bf16.msra.mxu1 %v2937_v15 }
 0x2e1   :  { %2537 = vmatprep.subr.bf16.mxu1 %v2854_v2 }
 0x39b   :  { %v420_v51 = vpop.f32.mrf.mxu1 }
 0x39c   :  { %v426_v52 = vadd.f32 %v420_v51, %v251_v50 }
 0x39d   :  { %v2527_v53 = vpop.f32.mrf.mxu1 }
 0x39e   :  { %2740 = vtanh.f32 %v426_v52  ;;  %v2324_v57 = vmul.f32 -1.442695, %v426_v52 }
 0x39f   :  { %v423_v54 = vpop.f32.mrf.mxu1 }
 0x3a0   :  { %2742 = vpow2.f32 %v2324_v57  ;;  %v2726_v57 = vld [vmem:[%s3480_s0 + $0x24] ss:$8 sps:$4 sm:$0xff]  }
 0x3a1   :  { %v2528_v55 = vpop.f32.mrf.mxu1  ;;  %261 = vmatprep.mubr.bf16.mxu0 %v2726_v57 }
 0x3ab   :  { %v2741_v56 = vpop.eup %2740 }
 0x3ac   :  { %436 = vrot.lane.b32.xlu0 %v2741_v56, %s2857_s1 }
 0x3ad   :  { %v2743_v58 = vpop.eup %2742 }
 0x3ae   :  { %v430_v59 = vadd.f32 1.0, %v2743_v58  ;;  %v2728_v58 = vld [vmem:[%s3480_s0 + $0x20] ss:$8 sps:$4 sm:$0xff]  }
 0x3af   :  { %262 = vmatmul.mubr.bf16.gmra.mxu0 %v2728_v58 }
 0x3b0   :  { %2744 = vrcp.f32 %v430_v59 }
 0x3bd   :  { %v2745_v60 = vpop.eup %2744 }
 0x3be   :  { %v434_v63 = vmul.f32 %v2745_v60, %v361_v41 }
 0x41e   :  { %v437_v61 = vpop.permute.xlu0 %436 }
 0x41f   :  { %v439_v62 = vmul.f32 %v2745_v60, %v437_v61 }
 0x421   :  { %441 = vrot.lane.b32.xlu1 %v439_v62, %s2857_s1 }
 0x493   :  { %v442_v0 = vpop.permute.xlu1 %441 }
 0x494   :  { %v444_v1 = vadd.f32 %v442_v0, %v434_v63  ;;  %v2423_v0 = vpop.f32.mrf.mxu0 }
 0x496   :  { %2746 = vtanh.f32 %v444_v1 }
 0x4a3   :  { %v2747_v5 = vpop.eup %2746 }
 0x4a4   :  { %447 = vrot.lane.b32.xlu0 %v2747_v5, %s2857_s1 }
 0x516   :  { %v448_v6 = vpop.permute.xlu0 %447 }
 0x517   :  { %v2996_v7 = vmul.f32 %v2745_v60, %v448_v6 }
 0x519   :  { %v460_v8 = vpack.c.bf16 %v2996_v7, %v2996_v7 }
 0x51b   :  { %463 = vrot.lane.b32.xlu1 %v460_v8, %s2858_s5 }
 0x58d   :  { %v464_v9 = vpop.permute.xlu1 %463 }
 0x58e   :  { %2534 = vmatmul.mubr.msk.bf16.vlgmr.msra.gmra.mxu1 %vm299_vm1, %v464_v9 }
 0x58f   :  { %2538 = vmatpush3.bf16.msra.mxu1 %v2921_v11  ;;  %2541 = vmatprep.mubr.msk.bf16.mxu1 %vm2855_vm0, %v2854_v2 }
 0x590   :  { %2539 = vmatprep.subr.bf16.mxu1 %v2854_v2 }
 0x593   :  { %2540 = vmatpush3.bf16.msra.mxu1 %v2937_v15 }
 0x594   :  { %2545 = vmatprep.subr.bf16.mxu1 %v2854_v2 }
 0x64e   :  { %v502_v16 = vpop.f32.mrf.mxu1 }
 0x64f   :  { %v508_v17 = vadd.f32 %v502_v16, %v256_v14 }
 0x650   :  { %v2535_v18 = vpop.f32.mrf.mxu1 }
 0x651   :  { %2748 = vtanh.f32 %v508_v17  ;;  %v2326_v22 = vmul.f32 -1.442695, %v508_v17 }
 0x652   :  { %v505_v19 = vpop.f32.mrf.mxu1 }
 0x653   :  { %2750 = vpow2.f32 %v2326_v22 }
 0x654   :  { %v2536_v20 = vpop.f32.mrf.mxu1 }
 0x65e   :  { %v2749_v21 = vpop.eup %2748 }
 0x65f   :  { %518 = vrot.lane.b32.xlu0 %v2749_v21, %s2857_s1 }
 0x660   :  { %v2751_v23 = vpop.eup %2750 }
 0x661   :  { %v512_v24 = vadd.f32 1.0, %v2751_v23 }
 0x663   :  { %2752 = vrcp.f32 %v512_v24 }
 0x670   :  { %v2753_v25 = vpop.eup %2752 }
 0x671   :  { %v516_v29 = vmul.f32 %v2753_v25, %v444_v1  ;;  %v2424_v1 = vpop.f32.mrf.mxu0 }
 0x672   :  { %v2425_v3 = vadd.f32 %v2424_v1, %v2423_v0 }
 0x674   :  { %v264_v4 = vadd.f32 %v2425_v3, %v2968_v27 }
 0x6d1   :  { %v519_v26 = vpop.permute.xlu0 %518 }
 0x6d2   :  { %v521_v28 = vmul.f32 %v2753_v25, %v519_v26 }
 0x6d4   :  { %523 = vrot.lane.b32.xlu1 %v521_v28, %s2857_s1 }
 0x746   :  { %v524_v30 = vpop.permute.xlu1 %523 }
 0x747   :  { %v526_v31 = vadd.f32 %v524_v30, %v516_v29  ;;  %v2426_v29 = vpop.f32.mrf.mxu0 }
 0x749   :  { %2754 = vtanh.f32 %v526_v31  ;;  %v2427_v30 = vpop.f32.mrf.mxu0 }
 0x756   :  { %v2755_v32 = vpop.eup %2754 }
 0x757   :  { %529 = vrot.lane.b32.xlu0 %v2755_v32, %s2857_s1 }
 0x7c9   :  { %v530_v33 = vpop.permute.xlu0 %529 }
 0x7ca   :  { %v3012_v34 = vmul.f32 %v2753_v25, %v530_v33 }
 0x7cc   :  { %v542_v35 = vpack.c.bf16 %v3012_v34, %v3012_v34 }
 0x7ce   :  { %545 = vrot.lane.b32.xlu1 %v542_v35, %s2858_s5 }
 0x840   :  { %v546_v36 = vpop.permute.xlu1 %545 }
 0x841   :  { %2542 = vmatmul.mubr.msk.bf16.vlgmr.msra.gmra.mxu1 %vm299_vm1, %v546_v36 }
 0x842   :  { %2546 = vmatpush3.bf16.msra.mxu1 %v2921_v11  ;;  %2549 = vmatprep.mubr.msk.bf16.mxu1 %vm2855_vm0, %v2854_v2 }
 0x843   :  { %2547 = vmatprep.subr.bf16.mxu1 %v2854_v2 }
 0x846   :  { %2548 = vmatpush3.bf16.msra.mxu1 %v2937_v15 }
 0x847   :  { %2553 = vmatprep.subr.bf16.mxu1 %v2854_v2 }
 0x901   :  { %v584_v41 = vpop.f32.mrf.mxu1 }
 0x902   :  { %v590_v42 = vadd.f32 %v584_v41, %v259_v40 }
 0x903   :  { %v2543_v43 = vpop.f32.mrf.mxu1 }
 0x904   :  { %2756 = vtanh.f32 %v590_v42  ;;  %v2328_v48 = vmul.f32 -1.442695, %v590_v42 }
 0x905   :  { %v587_v45 = vpop.f32.mrf.mxu1 }
 0x906   :  { %2758 = vpow2.f32 %v2328_v48 }
 0x907   :  { %v2544_v46 = vpop.f32.mrf.mxu1 }
 0x911   :  { %v2757_v47 = vpop.eup %2756 }
 0x912   :  { %600 = vrot.lane.b32.xlu0 %v2757_v47, %s2857_s1 }
 0x913   :  { %v2759_v49 = vpop.eup %2758 }
 0x914   :  { %v594_v50 = vadd.f32 1.0, %v2759_v49 }
 0x916   :  { %2760 = vrcp.f32 %v594_v50  ;;  %v2729_v50 = vld [vmem:[%s3480_s0 + $0x34] ss:$8 sps:$4 sm:$0xff]  }
 0x917   :  { %269 = vmatprep.mubr.bf16.mxu0 %v2729_v50 }
 0x923   :  { %v2761_v51 = vpop.eup %2760 }
 0x924   :  { %v598_v54 = vmul.f32 %v2761_v51, %v526_v31  ;;  %v2428_v31 = vadd.f32 %v2427_v30, %v2426_v29 }
 0x926   :  { %v267_v32 = vadd.f32 %v2428_v31, %v2968_v27 }
 0x984   :  { %v601_v52 = vpop.permute.xlu0 %600 }
 0x985   :  { %v603_v53 = vmul.f32 %v2761_v51, %v601_v52 }
 0x987   :  { %605 = vrot.lane.b32.xlu1 %v603_v53, %s2857_s1 }
 0x9f9   :  { %v606_v55 = vpop.permute.xlu1 %605 }
 0x9fa   :  { %v608_v56 = vadd.f32 %v606_v55, %v598_v54 }
 0x9fc   :  { %2762 = vtanh.f32 %v608_v56 }
 0xa09   :  { %v2763_v59 = vpop.eup %2762 }
 0xa0a   :  { %611 = vrot.lane.b32.xlu0 %v2763_v59, %s2857_s1 }
 0xa7c   :  { %v612_v60 = vpop.permute.xlu0 %611 }
 0xa7d   :  { %v3034_v61 = vmul.f32 %v2761_v51, %v612_v60  ;;  %v2731_v51 = vld [vmem:[%s3480_s0 + $0x30] ss:$8 sps:$4 sm:$0xff]   ;;  %s2860_s0 = smov 48  }
 0xa7e   :  { %270 = vmatmul.mubr.bf16.gmra.mxu0 %v2731_v51  ;;  %v59_v51 = vld [vmem:[%s3482_s2 + $0x20] sm:$0xff] }
 0xa7f   :  { %v624_v62 = vpack.c.bf16 %v3034_v61, %v3034_v61 }
 0xa81   :  { %627 = vrot.lane.b32.xlu1 %v624_v62, %s2858_s5 }
 0xaf3   :  { %v628_v63 = vpop.permute.xlu1 %627 }
 0xaf4   :  { %2550 = vmatmul.mubr.msk.bf16.vlgmr.msra.gmra.mxu1 %vm299_vm1, %v628_v63 }
 0xaf5   :  { %2554 = vmatpush3.bf16.msra.mxu1 %v2921_v11  ;;  %2557 = vmatprep.mubr.msk.bf16.mxu1 %vm2855_vm0, %v2854_v2 }
 0xaf6   :  { %2555 = vmatprep.subr.bf16.mxu1 %v2854_v2 }
 0xaf9   :  { %2556 = vmatpush3.bf16.msra.mxu1 %v2937_v15 }
 0xafa   :  { %2561 = vmatprep.subr.bf16.mxu1 %v2854_v2 }
 0xb3e   :  { %v2429_v57 = vpop.f32.mrf.mxu0 }
 0xb40   :  { %v2430_v58 = vpop.f32.mrf.mxu0 }
 0xb41   :  { %v2431_v59 = vadd.f32 %v2430_v58, %v2429_v57 }
 0xb43   :  { %v272_v60 = vadd.f32 %v2431_v59, %v2968_v27 }
 0xbb4   :  { %v666_v5 = vpop.f32.mrf.mxu1 }
 0xbb5   :  { %v672_v6 = vadd.f32 %v666_v5, %v264_v4 }
 0xbb6   :  { %v2551_v8 = vpop.f32.mrf.mxu1 }
 0xbb7   :  { %2764 = vtanh.f32 %v672_v6  ;;  %v2330_v13 = vmul.f32 -1.442695, %v672_v6 }
 0xbb8   :  { %v669_v9 = vpop.f32.mrf.mxu1 }
 0xbb9   :  { %2766 = vpow2.f32 %v2330_v13 }
 0xbba   :  { %v2552_v10 = vpop.f32.mrf.mxu1 }
 0xbc4   :  { %v2765_v12 = vpop.eup %2764 }
 0xbc5   :  { %682 = vrot.lane.b32.xlu0 %v2765_v12, %s2857_s1 }
 0xbc6   :  { %v2767_v14 = vpop.eup %2766 }
 0xbc7   :  { %v676_v16 = vadd.f32 1.0, %v2767_v14 }
 0xbc9   :  { %2768 = vrcp.f32 %v676_v16 }
 0xbd6   :  { %v2769_v17 = vpop.eup %2768 }
 0xbd7   :  { %v680_v20 = vmul.f32 %v2769_v17, %v608_v56 }
 0xc37   :  { %v683_v18 = vpop.permute.xlu0 %682 }
 0xc38   :  { %v685_v19 = vmul.f32 %v2769_v17, %v683_v18 }
 0xc3a   :  { %687 = vrot.lane.b32.xlu1 %v685_v19, %s2857_s1 }
 0xcac   :  { %v688_v21 = vpop.permute.xlu1 %687 }
 0xcad   :  { %v690_v22 = vadd.f32 %v688_v21, %v680_v20  ;;  %v2432_v20 = vpop.f32.mrf.mxu0 }
 0xcaf   :  { %2770 = vtanh.f32 %v690_v22  ;;  %v2433_v21 = vpop.f32.mrf.mxu0 }
 0xcbc   :  { %v2771_v23 = vpop.eup %2770 }
 0xcbd   :  { %693 = vrot.lane.b32.xlu0 %v2771_v23, %s2857_s1 }
 0xd2f   :  { %v694_v24 = vpop.permute.xlu0 %693 }
 0xd30   :  { %v3050_v25 = vmul.f32 %v2769_v17, %v694_v24 }
 0xd32   :  { %v706_v26 = vpack.c.bf16 %v3050_v25, %v3050_v25 }
 0xd34   :  { %709 = vrot.lane.b32.xlu1 %v706_v26, %s2858_s5 }
 0xda6   :  { %v710_v28 = vpop.permute.xlu1 %709 }
 0xda7   :  { %2558 = vmatmul.mubr.msk.bf16.vlgmr.msra.gmra.mxu1 %vm299_vm1, %v710_v28 }
 0xda8   :  { %2562 = vmatpush3.bf16.msra.mxu1 %v2921_v11  ;;  %2565 = vmatprep.mubr.msk.bf16.mxu1 %vm2855_vm0, %v2854_v2 }
 0xda9   :  { %2563 = vmatprep.subr.bf16.mxu1 %v2854_v2 }
 0xdac   :  { %2564 = vmatpush3.bf16.msra.mxu1 %v2937_v15 }
 0xdad   :  { %2569 = vmatprep.subr.bf16.mxu1 %v2854_v2 }
 0xe67   :  { %v748_v33 = vpop.f32.mrf.mxu1 }
 0xe68   :  { %v754_v35 = vadd.f32 %v748_v33, %v267_v32 }
 0xe69   :  { %v2559_v36 = vpop.f32.mrf.mxu1 }
 0xe6a   :  { %2772 = vtanh.f32 %v754_v35  ;;  %v2332_v40 = vmul.f32 -1.442695, %v754_v35 }
 0xe6b   :  { %v751_v37 = vpop.f32.mrf.mxu1 }
 0xe6c   :  { %2774 = vpow2.f32 %v2332_v40  ;;  %v2859_v40 = vmov -10000.0  }
 0xe6d   :  { %v2560_v38 = vpop.f32.mrf.mxu1 }
 0xe77   :  { %v2773_v39 = vpop.eup %2772 }
 0xe78   :  { %764 = vrot.lane.b32.xlu0 %v2773_v39, %s2857_s1 }
 0xe79   :  { %v2775_v41 = vpop.eup %2774 }
 0xe7a   :  { %v758_v42 = vadd.f32 1.0, %v2775_v41 }
 0xe7c   :  { %2776 = vrcp.f32 %v758_v42 }
 0xe89   :  { %v2777_v43 = vpop.eup %2776 }
 0xe8a   :  { %v762_v47 = vmul.f32 %v2777_v43, %v690_v22  ;;  %v2434_v22 = vadd.f32 %v2433_v21, %v2432_v20 }
 0xe8c   :  { %v275_v23 = vadd.f32 %v2434_v22, %v2968_v27  ;;  %v1247_v27 = vlaneseq }
 0xe8e   :  { %v3097_v39 = vand.u32 127, %v1247_v27 }
 0xe90   :  { %vm1249_vm2 = vcmp.eq.s32.totalorder %v3097_v39, 8 }
 0xe91   :  { %v1250_v41 = vsel %vm1249_vm2, 0.0, %v2859_v40 }
 0xe92   :  { %v1252_v42 = vsel %vm1238_vm3, %v1250_v41, -inf }
 0xeea   :  { %v765_v45 = vpop.permute.xlu0 %764 }
 0xeeb   :  { %v767_v46 = vmul.f32 %v2777_v43, %v765_v45 }
 0xeed   :  { %769 = vrot.lane.b32.xlu1 %v767_v46, %s2857_s1 }
 0xf5f   :  { %v770_v48 = vpop.permute.xlu1 %769 }
 0xf60   :  { %v772_v49 = vadd.f32 %v770_v48, %v762_v47  ;;  %v57_v48 = vld [vmem:[%s3482_s2 + $0x10] sm:$0xff] }
 0xf61   :  { %2593 = vmatprep.subr.mxu0 %v57_v48 }
 0xf62   :  { %2778 = vtanh.f32 %v772_v49  ;;  %2594 = vmatpush3.msra.mxu0 %v57_v48 }
 0xf6f   :  { %v2779_v52 = vpop.eup %2778 }
 0xf70   :  { %775 = vrot.lane.b32.xlu0 %v2779_v52, %s2857_s1  ;;  %v58_v52 = vld [vmem:[%s3482_s2 + $0x18] sm:$0xff] }
 0xfe2   :  { %v776_v53 = vpop.permute.xlu0 %775 }
 0xfe3   :  { %v3072_v54 = vmul.f32 %v2777_v43, %v776_v53  ;;  %v56_v53 = vld [vmem:[%s3482_s2 + $0x8] sm:$0xff] }
 0xfe4   :  { %2595 = vmatprep.subr.mxu0 %v56_v53 }
 0xfe5   :  { %v788_v55 = vpack.c.bf16 %v3072_v54, %v3072_v54  ;;  %2596 = vmatpush3.msra.mxu0 %v56_v53 }
 0xfe6   :  { %2623 = vmatprep.subr.mxu0 %v2854_v2 }
 0xfe7   :  { %791 = vrot.lane.b32.xlu1 %v788_v55, %s2858_s5 }
0x1059   :  { %v792_v56 = vpop.permute.xlu1 %791 }
0x105a   :  { %2566 = vmatmul.mubr.msk.bf16.vlgmr.msra.gmra.mxu1 %vm299_vm1, %v792_v56 }
0x105b   :  { %2570 = vmatpush3.bf16.msra.mxu1 %v2921_v11  ;;  %2573 = vmatprep.mubr.msk.bf16.mxu1 %vm2855_vm0, %v2854_v2 }
0x105c   :  { %2571 = vmatprep.subr.bf16.mxu1 %v2854_v2 }
0x105f   :  { %2572 = vmatpush3.bf16.msra.mxu1 %v2937_v15 }
0x1060   :  { %2577 = vmatprep.subr.mxu1 %v59_v51 }
0x111a   :  { %v830_v62 = vpop.f32.mrf.mxu1 }
0x111b   :  { %v836_v63 = vadd.f32 %v830_v62, %v272_v60 }
0x111c   :  { %v2567_v0 = vpop.f32.mrf.mxu1 }
0x111d   :  { %2780 = vtanh.f32 %v836_v63  ;;  %v2334_v11 = vmul.f32 -1.442695, %v836_v63 }
0x111e   :  { %v833_v1 = vpop.f32.mrf.mxu1 }
0x111f   :  { %2782 = vpow2.f32 %v2334_v11 }
0x1120   :  { %v2568_v3 = vpop.f32.mrf.mxu1 }
0x112a   :  { %v2781_v4 = vpop.eup %2780 }
0x112b   :  { %846 = vrot.lane.b32.xlu0 %v2781_v4, %s2857_s1  ;;  %v3151_v4 = vld [vmem:[%s3482_s2 + $0x48] sm:$0x3] }
0x112c   :  { %v2783_v5 = vpop.eup %2782 }
0x112d   :  { %v840_v6 = vadd.f32 1.0, %v2783_v5  ;;  %v3159_v5 = vld [vmem:[%s3482_s2 + $0x40] sm:$0xff] }
0x112f   :  { %2784 = vrcp.f32 %v840_v6 }
0x113c   :  { %v2785_v15 = vpop.eup %2784 }
0x113d   :  { %v844_v10 = vmul.f32 %v2785_v15, %v772_v49 }
0x119d   :  { %v847_v8 = vpop.permute.xlu0 %846 }
0x119e   :  { %v849_v9 = vmul.f32 %v2785_v15, %v847_v8 }
0x11a0   :  { %851 = vrot.lane.b32.xlu1 %v849_v9, %s2857_s1 }
0x1212   :  { %v852_v12 = vpop.permute.xlu1 %851 }
0x1213   :  { %v854_v13 = vadd.f32 %v852_v12, %v844_v10 }
0x1215   :  { %2786 = vtanh.f32 %v854_v13 }
0x1222   :  { %v2787_v14 = vpop.eup %2786 }
0x1223   :  { %857 = vrot.lane.b32.xlu0 %v2787_v14, %s2857_s1 }
0x1295   :  { %v858_v16 = vpop.permute.xlu0 %857 }
0x1296   :  { %v3087_v17 = vmul.f32 %v2785_v15, %v858_v16 }
0x1298   :  { %v870_v18 = vpack.c.bf16 %v3087_v17, %v3087_v17 }
0x129a   :  { %873 = vrot.lane.b32.xlu1 %v870_v18, %s2858_s5 }
0x130c   :  { %v874_v19 = vpop.permute.xlu1 %873 }
0x130d   :  { %2574 = vmatmul.mubr.msk.bf16.vlgmr.msra.gmra.mxu1 %vm299_vm1, %v874_v19 }
0x130e   :  { %2578 = vmatpush3.msra.mxu1 %v59_v51 }
0x130f   :  { %2579 = vmatprep.subr.mxu1 %v58_v52 }
0x1310   :  { %2580 = vmatpush3.msra.mxu1 %v58_v52 }
0x1311   :  { %2609 = vmatprep.subr.mxu1 %v2854_v2 }
0x13cd   :  { %v912_v24 = vpop.f32.mrf.mxu1 }
0x13ce   :  { %v918_v26 = vadd.f32 %v912_v24, %v275_v23 }
0x13cf   :  { %v2575_v28 = vpop.f32.mrf.mxu1 }
0x13d0   :  { %2788 = vtanh.f32 %v918_v26  ;;  %v2336_v32 = vmul.f32 -1.442695, %v918_v26 }
0x13d1   :  { %v915_v29 = vpop.f32.mrf.mxu1 }
0x13d2   :  { %2790 = vpow2.f32 %v2336_v32  ;;  %v3206_v29 = vld [vmem:[%s3482_s2 + $0x28] ss:$0 sm:$0xff] }
0x13d3   :  { %v2576_v30 = vpop.f32.mrf.mxu1 }
0x13dd   :  { %v2789_v31 = vpop.eup %2788 }
0x13de   :  { %928 = vrot.lane.b32.xlu0 %v2789_v31, %s2857_s1 }
0x13df   :  { %v2791_v33 = vpop.eup %2790 }
0x13e0   :  { %v922_v35 = vadd.f32 1.0, %v2791_v33 }
0x13e2   :  { %2792 = vrcp.f32 %v922_v35 }
0x13ef   :  { %v2793_v36 = vpop.eup %2792 }
0x13f0   :  { %v926_v43 = vmul.f32 %v2793_v36, %v854_v13 }
0x1450   :  { %v929_v37 = vpop.permute.xlu0 %928 }
0x1451   :  { %v931_v38 = vmul.f32 %v2793_v36, %v929_v37 }
0x1453   :  { %933 = vrot.lane.b32.xlu1 %v931_v38, %s2857_s1 }
0x1477   :  { %1253 = vmax.xlane.f32.xlu1 %v1252_v42 }
0x1488   :  { %452 = vrot.lane.b32.xlu1 %v2996_v7, %s2858_s5 }
0x14c5   :  { %v934_v45 = vpop.permute.xlu1 %933 }
0x14c6   :  { %v936_v46 = vadd.f32 %v934_v45, %v926_v43 }
0x14c8   :  { %2794 = vtanh.f32 %v936_v46 }
0x14d5   :  { %v2795_v47 = vpop.eup %2794 }
0x14d6   :  { %939 = vrot.lane.b32.xlu0 %v2795_v47, %s2857_s1 }
0x14da   :  { %866 = vrot.lane.b32.xlu0 %v3087_v17, %s2860_s0 }
0x14de   :  { %784 = vrot.lane.b32.xlu0 %v3072_v54, %s2860_s0 }
0x14e2   :  { %702 = vrot.lane.b32.xlu0 %v3050_v25, %s2860_s0 }
0x14e6   :  { %620 = vrot.lane.b32.xlu0 %v3034_v61, %s2860_s0 }
0x1500   :  { %v3115_v49 = vpop.xlane.xlu1 %1253 }
0x1501   :  { %v1255_v63 = vsub.f32 %v1250_v41, %v3115_v49 }
0x1504   :  { %v453_v50 = vpop.permute.xlu1 %452 }
0x1505   :  { %455 = vst.msk [vmem:[#allocation3 + $0x8] sm:$0xff] %vm372_vm4, %v453_v50 }
0x150c   :  { %v953_v18 = vld [vmem:[#allocation3 + $0x8] sm:$0xff] }
0x1548   :  { %v940_v55 = vpop.permute.xlu0 %939 }
0x1549   :  { %v3128_v56 = vmul.f32 %v2793_v36, %v940_v55 }
0x154b   :  { %948 = vrot.lane.b32.xlu0 %v3128_v56, %s2860_s0 }
0x154c   :  { %v867_v57 = vpop.permute.xlu0 %866 }
0x154d   :  { %869 = vst.msk [vmem:[#allocation4 + $0x8] sm:$0xff] %vm372_vm4, %v867_v57 }
0x154f   :  { %538 = vrot.lane.b32.xlu0 %v3012_v34, %s2860_s0 }
0x1550   :  { %v785_v58 = vpop.permute.xlu0 %784 }
0x1551   :  { %787 = vst.msk [vmem:[#allocation4 + $0x10] sm:$0xff] %vm372_vm4, %v785_v58 }
0x1553   :  { %456 = vrot.lane.b32.xlu0 %v2996_v7, %s2860_s0  ;;  %v1256_v7 = vmul.f32 1.442695, %v1255_v63 }
0x1554   :  { %v703_v59 = vpop.permute.xlu0 %702 }
0x1555   :  { %705 = vst.msk [vmem:[#allocation4 + $0x18] sm:$0xff] %vm372_vm4, %v703_v59  ;;  %2796 = vpow2.f32 %v1256_v7 }
0x1557   :  { %374 = vrot.lane.b32.xlu0 %v2974_v44, %s2860_s0 }
0x1558   :  { %v621_v60 = vpop.permute.xlu0 %620  ;;  %v962_v11 = vld [vmem:[#allocation4 + $0x10] sm:$0xff] }
0x1559   :  { %623 = vst.msk [vmem:[#allocation4 + $0x20] sm:$0xff] %vm372_vm4, %v621_v60 }
0x155b   :  { %369 = vrot.lane.b32.xlu0 %v2974_v44, %s2858_s5  ;;  %v961_v44 = vld [vmem:[#allocation4 + $0x8] sm:$0xff] }
0x155c   :  { %v963_v15 = vld [vmem:[#allocation4 + $0x18] sm:$0xff] }
0x1560   :  { %v964_v8 = vld [vmem:[#allocation4 + $0x20] sm:$0xff] }
0x1562   :  { %v2797_v14 = vpop.eup %2796 }
0x15bd   :  { %v949_v62 = vpop.permute.xlu0 %948 }
0x15be   :  { %951 = vst.msk [vmem:[#allocation4] sm:$0xff] %vm372_vm4, %v949_v62 }
0x15c1   :  { %v539_v0 = vpop.permute.xlu0 %538 }
0x15c2   :  { %541 = vst.msk [vmem:[#allocation4 + $0x28] sm:$0xff] %vm372_vm4, %v539_v0 }
0x15c5   :  { %v457_v1 = vpop.permute.xlu0 %456  ;;  %v960_v3 = vld [vmem:[#allocation4] sm:$0xff] }
0x15c6   :  { %459 = vst.msk [vmem:[#allocation4 + $0x30] sm:$0xff] %vm372_vm4, %v457_v1  ;;  %2581 = vmatprep.mubr.msk.f32.mxu1 %vm372_vm4, %v960_v3 }
0x15c7   :  { %2582 = vmatmul.mubr.msk.f32.vlgmr.msra.gmra.mxu1 %vm372_vm4, %v961_v44 }
0x15c8   :  { %2610 = vmatpush3.msk.msra.mxu1 %vm1261_vm5, %v3151_v4  ;;  %2584 = vmatprep.mubr.msk.f32.mxu1 %vm372_vm4, %v962_v11 }
0x15c9   :  { %v375_v6 = vpop.permute.xlu0 %374  ;;  %2611 = vmatprep.subr.mxu1 %v2854_v2  ;;  %v965_v10 = vld [vmem:[#allocation4 + $0x28] sm:$0xff] }
0x15ca   :  { %377 = vst.msk [vmem:[#allocation4 + $0x38] sm:$0xff] %vm372_vm4, %v375_v6  ;;  %2612 = vmatpush3.msra.mxu1 %v3159_v5 }
0x15cb   :  { %2585 = vmatmul.mubr.msk.f32.gmra.mxu1 %vm372_vm4, %v963_v15  ;;  %2616 = vmatprep.subr.mxu1 %v2854_v2 }
0x15cc   :  { %2587 = vmatprep.mubr.msk.f32.mxu1 %vm372_vm4, %v964_v8 }
0x15cd   :  { %v370_v9 = vpop.permute.xlu0 %369  ;;  %v966_v12 = vld [vmem:[#allocation4 + $0x30] sm:$0xff] }
0x15ce   :  { %373 = vst.msk [vmem:[#allocation3] sm:$0xff] %vm372_vm4, %v370_v9 }
0x15cf   :  { %2588 = vmatmul.mubr.msk.f32.gmra.mxu1 %vm372_vm4, %v965_v10 }
0x15d0   :  { %2590 = vmatprep.mubr.msk.f32.mxu1 %vm372_vm4, %v966_v12 }
0x15d1   :  { %v967_v13 = vld [vmem:[#allocation4 + $0x38] sm:$0xff] }
0x15d3   :  { %2591 = vmatmul.mubr.msk.f32.gmra.mxu1 %vm372_vm4, %v967_v13 }
0x15d4   :  { %2613 = vmatprep.mubr.msk.f32.mxu1 %vm2855_vm0, %v2854_v2 }
0x15d5   :  { %v952_v16 = vld [vmem:[#allocation3] sm:$0xff] }
0x15d6   :  { %2597 = vmatprep.mubr.msk.f32.mxu0 %vm372_vm4, %v952_v16 }
0x15d7   :  { %2598 = vmatmul.mubr.msk.f32.vlgmr.msra.gmra.mxu0 %vm372_vm4, %v953_v18  ;;  %2614 = vmatmul.mubr.msk.f32.vlgmr.msra.gmra.mxu1 %vm1238_vm3, %v2797_v14 }
0x15d8   :  { %2617 = vmatpush3.msk.msra.mxu1 %vm1261_vm5, %v3151_v4  ;;  %2620 = vmatprep.mubr.msk.f32.mxu1 %vm2855_vm0, %v2854_v2 }
0x15d9   :  { %2618 = vmatprep.subr.mxu1 %v2854_v2  ;;  %2624 = vmatpush3.msk.msra.mxu0 %vm1261_vm5, %v3151_v4 }
0x15da   :  { %2619 = vmatpush3.msra.mxu1 %v3159_v5  ;;  %2625 = vmatprep.subr.mxu0 %v2854_v2 }
0x15db   :  { %2626 = vmatpush3.msra.mxu0 %v3159_v5  ;;  %2630 = vmatprep.subr.mxu1 %v2854_v2 }
0x15dc   :  { %2637 = vmatprep.subr.mxu0 %v2854_v2 }
0x1687   :  { %v2583_v19 = vpop.f32.mrf.mxu1 }
0x1689   :  { %v1058_v20 = vpop.f32.mrf.mxu1 }
0x168b   :  { %v3191_v21 = vpop.f32.mrf.mxu1 }
0x168d   :  { %v3193_v22 = vpop.f32.mrf.mxu1 }
0x168f   :  { %v3195_v23 = vpop.f32.mrf.mxu1 }
0x1691   :  { %v3197_v24 = vpop.f32.mrf.mxu1 }
0x1693   :  { %v3199_v26 = vpop.f32.mrf.mxu1 }
0x1695   :  { %v3201_v28 = vpop.f32.mrf.mxu1 }
0x1697   :  { %v2599_v30 = vpop.f32.mrf.mxu0  ;;  %v1331_v31 = vpop.f32.mrf.mxu1 }
0x1698   :  { %v1193_v32 = vadd.f32 %v2599_v30, %v2583_v19  ;;  %2798 = vlog2.f32 %v1331_v31 }
0x1699   :  { %v1187_v33 = vpop.f32.mrf.mxu0  ;;  %v2615_v35 = vpop.f32.mrf.mxu1 }
0x169a   :  { %v3209_v36 = vadd.f32 %v3206_v29, %v1193_v32  ;;  %v1188_v37 = vadd.f32 %v1187_v33, %v1058_v20 }
0x169c   :  { %1240 = vst.msk [vmem:[#allocation5 + $0x8] sm:$0xff] %vm1238_vm3, %v3209_v36  ;;  %v3214_v38 = vadd.f32 %v3206_v29, %v1188_v37 }
0x169e   :  { %1239 = vst.msk [vmem:[#allocation5] sm:$0xff] %vm1238_vm3, %v3214_v38 }
0x16a3   :  { %v1339_v57 = vld [vmem:[#allocation5 + $0x8] sm:$0xff] }
0x16a5   :  { %v2799_v40 = vpop.eup %2798  ;;  %v1251_v41 = vld [vmem:[#allocation5] sm:$0xff] }
0x16a6   :  { %v1337_v42 = vmul.f32 0.6931472, %v2799_v40  ;;  %v1335_v43 = vadd.f32 %v3115_v49, %v1251_v41 }
0x16a8   :  { %v1338_v45 = vadd.f32 %v1337_v42, %v1335_v43 }
0x16aa   :  { %v1340_v46 = vsel %vm1238_vm3, %v1338_v45, -inf }
0x16ab   :  { %1341 = vmax.xlane.f32.xlu0 %v1340_v46 }
0x16c1   :  { %534 = vrot.lane.b32.xlu0 %v3012_v34, %s2858_s5 }
0x16c5   :  { %698 = vrot.lane.b32.xlu0 %v3050_v25, %s2858_s5 }
0x16c9   :  { %780 = vrot.lane.b32.xlu0 %v3072_v54, %s2858_s5 }
0x16cd   :  { %862 = vrot.lane.b32.xlu0 %v3087_v17, %s2858_s5 }
0x16d1   :  { %944 = vrot.lane.b32.xlu0 %v3128_v56, %s2858_s5 }
0x1734   :  { %v1342_v47 = vpop.xlane.xlu0 %1341 }
0x1735   :  { %v1343_v48 = vsub.f32 %v1338_v45, %v1342_v47  ;;  %v1419_v58 = vadd.f32 %v1342_v47, %v1339_v57 }
0x1737   :  { %v1344_v49 = vmul.f32 1.442695, %v1343_v48 }
0x1738   :  { %v535_v50 = vpop.permute.xlu0 %534 }
0x1739   :  { %2800 = vpow2.f32 %v1344_v49  ;;  %537 = vst.msk [vmem:[#allocation3 + $0x10] sm:$0xff] %vm372_vm4, %v535_v50 }
0x173c   :  { %v699_v34 = vpop.permute.xlu0 %698 }
0x173d   :  { %701 = vst.msk [vmem:[#allocation3 + $0x20] sm:$0xff] %vm372_vm4, %v699_v34 }
0x1740   :  { %v781_v25 = vpop.permute.xlu0 %780  ;;  %v954_v51 = vld [vmem:[#allocation3 + $0x10] sm:$0xff] }
0x1741   :  { %783 = vst.msk [vmem:[#allocation3 + $0x28] sm:$0xff] %vm372_vm4, %v781_v25  ;;  %2600 = vmatprep.mubr.msk.f32.mxu0 %vm372_vm4, %v954_v51 }
0x1744   :  { %v863_v54 = vpop.permute.xlu0 %862  ;;  %v956_v44 = vld [vmem:[#allocation3 + $0x20] sm:$0xff] }
0x1745   :  { %865 = vst.msk [vmem:[#allocation3 + $0x30] sm:$0xff] %vm372_vm4, %v863_v54 }
0x1746   :  { %v2801_v17 = vpop.eup %2800 }
0x1747   :  { %2621 = vmatmul.mubr.msk.f32.vlgmr.msra.gmra.mxu1 %vm1238_vm3, %v2801_v17 }
0x1748   :  { %v945_v52 = vpop.permute.xlu0 %944  ;;  %2631 = vmatpush3.msk.msra.mxu1 %vm1261_vm5, %v3151_v4  ;;  %2634 = vmatprep.mubr.msk.f32.mxu1 %vm2855_vm0, %v2854_v2  ;;  %v957_v11 = vld [vmem:[#allocation3 + $0x28] sm:$0xff] }
0x1749   :  { %947 = vst.msk [vmem:[#allocation3 + $0x38] sm:$0xff] %vm372_vm4, %v945_v52  ;;  %2632 = vmatprep.subr.mxu1 %v2854_v2 }
0x174a   :  { %2633 = vmatpush3.msra.mxu1 %v3159_v5 }
0x174b   :  { %2644 = vmatprep.subr.mxu1 %v2854_v2 }
0x174c   :  { %v958_v6 = vld [vmem:[#allocation3 + $0x30] sm:$0xff] }
0x1807   :  { %v1415_v53 = vpop.f32.mrf.mxu1 }
0x1808   :  { %2802 = vlog2.f32 %v1415_v53 }
0x1809   :  { %v2622_v55 = vpop.f32.mrf.mxu1 }
0x1815   :  { %v2803_v56 = vpop.eup %2802 }
0x1816   :  { %v1421_v59 = vmul.f32 0.6931472, %v2803_v56 }
0x1818   :  { %v1422_v60 = vadd.f32 %v1421_v59, %v1419_v58 }
0x181a   :  { %v1424_v62 = vsel %vm1238_vm3, %v1422_v60, -inf }
0x181b   :  { %1425 = vmax.xlane.f32.xlu1 %v1424_v62 }
0x182c   :  { %616 = vrot.lane.b32.xlu1 %v3034_v61, %s2858_s5  ;;  %v959_v61 = vld [vmem:[#allocation3 + $0x38] sm:$0xff] }
0x18a4   :  { %v1426_v63 = vpop.xlane.xlu1 %1425 }
0x18a5   :  { %v1427_v0 = vsub.f32 %v1422_v60, %v1426_v63 }
0x18a7   :  { %v1428_v1 = vmul.f32 1.442695, %v1427_v0 }
0x18a8   :  { %v617_v7 = vpop.permute.xlu1 %616 }
0x18a9   :  { %619 = vst.msk [vmem:[#allocation3 + $0x18] sm:$0xff] %vm372_vm4, %v617_v7  ;;  %2804 = vpow2.f32 %v1428_v1 }
0x18b0   :  { %v955_v3 = vld [vmem:[#allocation3 + $0x18] sm:$0xff] }
0x18b1   :  { %2601 = vmatmul.mubr.msk.f32.gmra.mxu0 %vm372_vm4, %v955_v3 }
0x18b2   :  { %2603 = vmatprep.mubr.msk.f32.mxu0 %vm372_vm4, %v956_v44 }
0x18b5   :  { %2604 = vmatmul.mubr.msk.f32.gmra.mxu0 %vm372_vm4, %v957_v11 }
0x18b6   :  { %2606 = vmatprep.mubr.msk.f32.mxu0 %vm372_vm4, %v958_v6  ;;  %v2805_v15 = vpop.eup %2804 }
0x18b9   :  { %2607 = vmatmul.mubr.msk.f32.gmra.mxu0 %vm372_vm4, %v959_v61 }
0x18ba   :  { %2627 = vmatprep.mubr.msk.f32.mxu0 %vm2855_vm0, %v2854_v2 }
0x18bd   :  { %2628 = vmatmul.mubr.msk.f32.vlgmr.msra.gmra.mxu0 %vm1238_vm3, %v2805_v15 }
0x18be   :  { %2638 = vmatpush3.msk.msra.mxu0 %vm1261_vm5, %v3151_v4  ;;  %2641 = vmatprep.mubr.msk.f32.mxu0 %vm2855_vm0, %v2854_v2 }
0x18bf   :  { %2639 = vmatprep.subr.mxu0 %v2854_v2 }
0x18c0   :  { %2640 = vmatpush3.msra.mxu0 %v3159_v5 }
0x18c1   :  { %2651 = vmatprep.subr.mxu0 %v2854_v2 }
0x1971   :  { %v2602_v8 = vpop.f32.mrf.mxu0 }
0x1972   :  { %v1203_v9 = vadd.f32 %v2602_v8, %v3191_v21 }
0x1973   :  { %v1197_v10 = vpop.f32.mrf.mxu0 }
0x1974   :  { %v3265_v12 = vadd.f32 %v3206_v29, %v1203_v9  ;;  %v1198_v13 = vadd.f32 %v1197_v10, %v3193_v22 }
0x1975   :  { %v2605_v14 = vpop.f32.mrf.mxu0 }
0x1976   :  { %1242 = vst.msk [vmem:[#allocation5 + $0x18] sm:$0xff] %vm1238_vm3, %v3265_v12  ;;  %v3271_v16 = vadd.f32 %v3206_v29, %v1198_v13  ;;  %v1213_v18 = vadd.f32 %v2605_v14, %v3195_v23 }
0x1977   :  { %v1207_v19 = vpop.f32.mrf.mxu0 }
0x1978   :  { %1241 = vst.msk [vmem:[#allocation5 + $0x10] sm:$0xff] %vm1238_vm3, %v3271_v16  ;;  %v3277_v20 = vadd.f32 %v3206_v29, %v1213_v18  ;;  %v1208_v21 = vadd.f32 %v1207_v19, %v3197_v24  ;;  %v3340_v18 = vld [vmem:[%s3483_s3 + $0x18] sm:$0xff]  ;;  %v3346_v19 = vld [vmem:[%s3483_s3 + $0x20] sm:$0xff] }
0x1979   :  { %v2608_v30 = vpop.f32.mrf.mxu0 }
0x197a   :  { %1244 = vst.msk [vmem:[#allocation5 + $0x28] sm:$0xff] %vm1238_vm3, %v3277_v20  ;;  %v3283_v22 = vadd.f32 %v3206_v29, %v1208_v21  ;;  %v1223_v31 = vadd.f32 %v2608_v30, %v3199_v26  ;;  %v3352_v21 = vld [vmem:[%s3483_s3 + $0x28] sm:$0xff]  ;;  %v3358_v30 = vld [vmem:[%s3483_s3 + $0x30] sm:$0xff] }
0x197b   :  { %v1217_v32 = vpop.f32.mrf.mxu0 }
0x197c   :  { %1243 = vst.msk [vmem:[#allocation5 + $0x20] sm:$0xff] %vm1238_vm3, %v3283_v22  ;;  %v3289_v23 = vadd.f32 %v3206_v29, %v1223_v31  ;;  %v1218_v33 = vadd.f32 %v1217_v32, %v3201_v28  ;;  %v3364_v31 = vld [vmem:[%s3483_s3 + $0x38] sm:$0xff] }
0x197d   :  { %v1499_v35 = vpop.f32.mrf.mxu0  ;;  %v1507_v34 = vld [vmem:[#allocation5 + $0x18] sm:$0xff] }
0x197e   :  { %1246 = vst.msk [vmem:[#allocation5 + $0x38] sm:$0xff] %vm1238_vm3, %v3289_v23  ;;  %v3295_v24 = vadd.f32 %v3206_v29, %v1218_v33  ;;  %2806 = vlog2.f32 %v1499_v35 }
0x197f   :  { %v2629_v37 = vpop.f32.mrf.mxu0  ;;  %v1423_v26 = vld [vmem:[#allocation5 + $0x10] sm:$0xff] }
0x1980   :  { %1245 = vst.msk [vmem:[#allocation5 + $0x30] sm:$0xff] %vm1238_vm3, %v3295_v24  ;;  %v1503_v42 = vadd.f32 %v1426_v63, %v1423_v26 }
0x1981   :  { %v1675_v8 = vld [vmem:[#allocation5 + $0x28] sm:$0xff] }
0x1983   :  { %v1591_v60 = vld [vmem:[#allocation5 + $0x20] sm:$0xff] }
0x198b   :  { %v2807_v40 = vpop.eup %2806 }
0x198c   :  { %v1505_v41 = vmul.f32 0.6931472, %v2807_v40 }
0x198e   :  { %v1506_v43 = vadd.f32 %v1505_v41, %v1503_v42 }
0x1990   :  { %v1508_v45 = vsel %vm1238_vm3, %v1506_v43, -inf }
0x1991   :  { %1509 = vmax.xlane.f32.xlu1 %v1508_v45  ;;  %v1759_v45 = vld [vmem:[#allocation5 + $0x30] sm:$0xff] }
0x1a1a   :  { %v1510_v28 = vpop.xlane.xlu1 %1509 }
0x1a1b   :  { %v1511_v46 = vsub.f32 %v1506_v43, %v1510_v28  ;;  %v1587_v25 = vadd.f32 %v1510_v28, %v1507_v34 }
0x1a1d   :  { %v1512_v47 = vmul.f32 1.442695, %v1511_v46 }
0x1a1f   :  { %2808 = vpow2.f32 %v1512_v47 }
0x1a2c   :  { %v2809_v48 = vpop.eup %2808 }
0x1a2d   :  { %2635 = vmatmul.mubr.msk.f32.vlgmr.msra.gmra.mxu1 %vm1238_vm3, %v2809_v48 }
0x1a2e   :  { %2645 = vmatpush3.msk.msra.mxu1 %vm1261_vm5, %v3151_v4  ;;  %2648 = vmatprep.mubr.msk.f32.mxu1 %vm2855_vm0, %v2854_v2 }
0x1a2f   :  { %2646 = vmatprep.subr.mxu1 %v2854_v2 }
0x1a30   :  { %2647 = vmatpush3.msra.mxu1 %v3159_v5 }
0x1a31   :  { %2658 = vmatprep.subr.mxu1 %v2854_v2 }
0x1aed   :  { %v1583_v29 = vpop.f32.mrf.mxu1 }
0x1aee   :  { %2810 = vlog2.f32 %v1583_v29  ;;  %v1961_v29 = vld [vmem:[%s3483_s3 + $0x8] sm:$0xff] }
0x1aef   :  { %v2636_v49 = vpop.f32.mrf.mxu1 }
0x1afb   :  { %v2811_v50 = vpop.eup %2810 }
0x1afc   :  { %v1589_v51 = vmul.f32 0.6931472, %v2811_v50 }
0x1afe   :  { %v1590_v54 = vadd.f32 %v1589_v51, %v1587_v25 }
0x1b00   :  { %v1592_v17 = vsel %vm1238_vm3, %v1590_v54, -inf }
0x1b01   :  { %1593 = vmax.xlane.f32.xlu0 %v1592_v17 }
0x1b8a   :  { %v1594_v52 = vpop.xlane.xlu0 %1593 }
0x1b8b   :  { %v1595_v53 = vsub.f32 %v1590_v54, %v1594_v52  ;;  %v1671_v62 = vadd.f32 %v1594_v52, %v1591_v60  ;;  %v62_v52 = vld [vmem:[%s3482_s2 + $0x38] sm:$0x3] }
0x1b8d   :  { %v1596_v55 = vmul.f32 1.442695, %v1595_v53 }
0x1b8f   :  { %2812 = vpow2.f32 %v1596_v55 }
0x1b9c   :  { %v2813_v56 = vpop.eup %2812 }
0x1b9d   :  { %2642 = vmatmul.mubr.msk.f32.vlgmr.msra.gmra.mxu0 %vm1238_vm3, %v2813_v56  ;;  %v61_v56 = vld [vmem:[%s3482_s2 + $0x30] sm:$0xff] }
0x1b9e   :  { %2652 = vmatpush3.msk.msra.mxu0 %vm1261_vm5, %v3151_v4  ;;  %2655 = vmatprep.mubr.msk.f32.mxu0 %vm2855_vm0, %v2854_v2 }
0x1b9f   :  { %2653 = vmatprep.subr.mxu0 %v2854_v2 }
0x1ba0   :  { %2654 = vmatpush3.msra.mxu0 %v3159_v5 }
0x1ba1   :  { %2665 = vmatprep.subr.msk.mxu0 %vm1261_vm5, %v62_v52 }
0x1c5d   :  { %v1667_v57 = vpop.f32.mrf.mxu0 }
0x1c5e   :  { %2814 = vlog2.f32 %v1667_v57  ;;  %v2861_v57 = vmov 1  }
0x1c5f   :  { %v2643_v58 = vpop.f32.mrf.mxu0 }
0x1c6b   :  { %v2815_v59 = vpop.eup %2814 }
0x1c6c   :  { %v1673_v63 = vmul.f32 0.6931472, %v2815_v59 }
0x1c6e   :  { %v1674_v0 = vadd.f32 %v1673_v63, %v1671_v62 }
0x1c70   :  { %v1676_v7 = vsel %vm1238_vm3, %v1674_v0, -inf }
0x1c71   :  { %1677 = vmax.xlane.f32.xlu0 %v1676_v7 }
0x1cfa   :  { %v1678_v1 = vpop.xlane.xlu0 %1677 }
0x1cfb   :  { %v1679_v3 = vsub.f32 %v1674_v0, %v1678_v1  ;;  %v1755_v9 = vadd.f32 %v1678_v1, %v1675_v8  ;;  %v1843_v8 = vld [vmem:[#allocation5 + $0x38] sm:$0xff] }
0x1cfd   :  { %v1680_v44 = vmul.f32 1.442695, %v1679_v3 }
0x1cff   :  { %2816 = vpow2.f32 %v1680_v44 }
0x1d0c   :  { %v2817_v11 = vpop.eup %2816 }
0x1d0d   :  { %2649 = vmatmul.mubr.msk.f32.vlgmr.msra.gmra.mxu1 %vm1238_vm3, %v2817_v11 }
0x1d0e   :  { %2659 = vmatpush3.msk.msra.mxu1 %vm1261_vm5, %v3151_v4  ;;  %2662 = vmatprep.mubr.msk.f32.mxu1 %vm2855_vm0, %v2854_v2  ;;  %v3328_v4 = vld [vmem:[%s3483_s3] sm:$0xff] }
0x1d0f   :  { %2660 = vmatprep.subr.mxu1 %v2854_v2 }
0x1d10   :  { %2661 = vmatpush3.msra.mxu1 %v3159_v5  ;;  %v3334_v5 = vld [vmem:[%s3483_s3 + $0x10] sm:$0xff] }
0x1dcd   :  { %v1751_v6 = vpop.f32.mrf.mxu1 }
0x1dce   :  { %2818 = vlog2.f32 %v1751_v6  ;;  %v3412_v6 = vshrl.u32 %v1247_v27, 7 }
0x1dcf   :  { %v2650_v61 = vpop.f32.mrf.mxu1 }
0x1dd0   :  { %v1929_v61 = vsub.s32 1, %v3412_v6 }
0x1ddb   :  { %v2819_v15 = vpop.eup %2818 }
0x1ddc   :  { %v1757_v10 = vmul.f32 0.6931472, %v2819_v15 }
0x1dde   :  { %v1758_v13 = vadd.f32 %v1757_v10, %v1755_v9 }
0x1de0   :  { %v1760_v14 = vsel %vm1238_vm3, %v1758_v13, -inf }
0x1de1   :  { %1761 = vmax.xlane.f32.xlu1 %v1760_v14 }
0x1df2   :  { %1969 = vperm.xlu1 %2698, %v3328_v4  }
0x1df6   :  { %1975 = vperm.xlu1 %2698, %v3334_v5  }
0x1dfa   :  { %1978 = vperm.xlu1 %2698, %v3340_v18  }
0x1dfe   :  { %1981 = vperm.xlu1 %2698, %v3346_v19  }
0x1e02   :  { %1984 = vperm.xlu1 %2698, %v3352_v21  }
0x1e06   :  { %1987 = vperm.xlu1 %2698, %v3358_v30  }
0x1e0a   :  { %1990 = vperm.xlu1 %2698, %v3364_v31  }
0x1e0e   :  { %2701 = vset.pattern.permute.xlu1 %v2861_v57 }
0x1e6a   :  { %v1762_v32 = vpop.xlane.xlu1 %1761 }
0x1e6b   :  { %v1763_v33 = vsub.f32 %v1758_v13, %v1762_v32  ;;  %v1839_v28 = vadd.f32 %v1762_v32, %v1759_v45  ;;  %v3415_v13 = vrot.slane %v62_v52, %v1929_v61 }
0x1e6d   :  { %v1764_v35 = vmul.f32 1.442695, %v1763_v33 }
0x1e6e   :  { %v1970_v37 = vpop.permute.xlu1 %1969 }
0x1e6f   :  { %2820 = vpow2.f32 %v1764_v35  ;;  %vm1992_vm6 = vcmp.eq.s32.totalorder %v1970_v37, %v3097_v39 }
0x1e70   :  { %v3369_v40 = vsel %vm1992_vm6, 1.0, %v2854_v2 }
0x1e72   :  { %v1976_v51 = vpop.permute.xlu1 %1975 }
0x1e73   :  { %vm1994_vm8 = vcmp.eq.s32.totalorder %v1976_v51, %v3097_v39 }
0x1e74   :  { %v2372_v60 = vsel %vm1994_vm8, 1.0, %v2854_v2  ;;  %vm1948_vm8 = vcmask 7168  }
0x1e76   :  { %v1979_v54 = vpop.permute.xlu1 %1978 }
0x1e77   :  { %vm1995_vm9 = vcmp.eq.s32.totalorder %v1979_v54, %v3097_v39 }
0x1e78   :  { %v2373_v62 = vsel %vm1995_vm9, 1.0, %v2854_v2 }
0x1e7a   :  { %v1982_v17 = vpop.permute.xlu1 %1981 }
0x1e7b   :  { %vm1996_vm10 = vcmp.eq.s32.totalorder %v1982_v17, %v3097_v39 }
0x1e7c   :  { %v2821_v26 = vpop.eup %2820  ;;  %v2374_v63 = vsel %vm1996_vm10, 1.0, %v2854_v2 }
0x1e7d   :  { %2656 = vmatmul.mubr.msk.f32.vlgmr.msra.gmra.mxu0 %vm1238_vm3, %v2821_v26 }
0x1e7e   :  { %2669 = vmatprep.mubr.msk.f32.mxu0 %vm1238_vm3, %v3369_v40  ;;  %2666 = vmatpush3.msk.msra.mxu0 %vm1261_vm5, %v62_v52  ;;  %v1985_v53 = vpop.permute.xlu1 %1984 }
0x1e7f   :  { %2667 = vmatprep.subr.mxu0 %v61_v56  ;;  %vm1997_vm11 = vcmp.eq.s32.totalorder %v1985_v53, %v3097_v39 }
0x1e80   :  { %2668 = vmatpush3.msra.mxu0 %v61_v56  ;;  %v2375_v7 = vsel %vm1997_vm11, 1.0, %v2854_v2 }
0x1e82   :  { %v1988_v58 = vpop.permute.xlu1 %1987 }
0x1e83   :  { %vm1998_vm12 = vcmp.eq.s32.totalorder %v1988_v58, %v3097_v39 }
0x1e84   :  { %v2376_v1 = vsel %vm1998_vm12, 1.0, %v2854_v2 }
0x1e86   :  { %v1991_v0 = vpop.permute.xlu1 %1990 }
0x1e87   :  { %vm1999_vm13 = vcmp.eq.s32.totalorder %v1991_v0, %v3097_v39 }
0x1e88   :  { %v3407_v3 = vsel %vm1999_vm13, 1.0, %v2854_v2 }
0x1f3d   :  { %v1835_v41 = vpop.f32.mrf.mxu0 }
0x1f3e   :  { %2822 = vlog2.f32 %v1835_v41 }
0x1f3f   :  { %v2657_v42 = vpop.f32.mrf.mxu0 }
0x1f4b   :  { %v2823_v43 = vpop.eup %2822 }
0x1f4c   :  { %v1841_v46 = vmul.f32 0.6931472, %v2823_v43  ;;  %v2067_v43 = vmul.f32 %v2373_v62, %v3265_v12 }
0x1f4e   :  { %v1842_v47 = vadd.f32 %v1841_v46, %v1839_v28  ;;  %v2077_v28 = vsel %vm1238_vm3, %v2067_v43, 0.0 }
0x1f50   :  { %v1844_v48 = vsel %vm1238_vm3, %v1842_v47, -inf }
0x1f51   :  { %1845 = vmax.xlane.f32.xlu0 %v1844_v48 }
0x1f67   :  { %1972 = vperm.xlu0 %2699, %v1961_v29  }
0x1f6b   :  { %2700 = vset.pattern.permute.xlu0 %v2861_v57 }
0x1fda   :  { %v1846_v49 = vpop.xlane.xlu0 %1845 }
0x1fdb   :  { %v1847_v50 = vsub.f32 %v1842_v47, %v1846_v49  ;;  %v1923_v9 = vadd.f32 %v1846_v49, %v1843_v8 }
0x1fdd   :  { %v1848_v34 = vmul.f32 1.442695, %v1847_v50 }
0x1fdf   :  { %2824 = vpow2.f32 %v1848_v34 }
0x1fe2   :  { %v1973_v55 = vpop.permute.xlu0 %1972 }
0x1fe3   :  { %vm1993_vm7 = vcmp.eq.s32.totalorder %v1973_v55, %v3097_v39 }
0x1fe4   :  { %v2371_v59 = vsel %vm1993_vm7, 1.0, %v2854_v2  ;;  %vm1946_vm7 = vcmp.lt.s32.totalorder %v3412_v6, 2 }
0x1fe5   :  { %2670 = vmatmul.mubr.msk.f32.vlgmr.msra.gmra.mxu0 %vm1238_vm3, %v2371_v59 }
0x1fe6   :  { %2672 = vmatprep.mubr.msk.f32.mxu0 %vm1238_vm3, %v2372_v60 }
0x1fe9   :  { %2673 = vmatmul.mubr.msk.f32.gmra.mxu0 %vm1238_vm3, %v2373_v62 }
0x1fea   :  { %2675 = vmatprep.mubr.msk.f32.mxu0 %vm1238_vm3, %v2374_v63 }
0x1fec   :  { %v2825_v25 = vpop.eup %2824 }
0x1fed   :  { %2663 = vmatmul.mubr.msk.f32.vlgmr.msra.gmra.mxu1 %vm1238_vm3, %v2825_v25  ;;  %2676 = vmatmul.mubr.msk.f32.gmra.mxu0 %vm1238_vm3, %v2375_v7 }
0x1fee   :  { %2678 = vmatprep.mubr.msk.f32.mxu0 %vm1238_vm3, %v2376_v1 }
0x1ff1   :  { %2679 = vmatmul.mubr.msk.f32.gmra.mxu0 %vm1238_vm3, %v3407_v3 }
0x20a5   :  { %v2671_v51 = vpop.f32.mrf.mxu0 }
0x20a7   :  { %v2190_v54 = vpop.f32.mrf.mxu0 }
0x20a9   :  { %v2674_v52 = vpop.f32.mrf.mxu0 }
0x20ab   :  { %v2200_v53 = vpop.f32.mrf.mxu0 }
0x20ad   :  { %v1919_v44 = vpop.f32.mrf.mxu1 }
0x20ae   :  { %2826 = vlog2.f32 %v1919_v44 }
0x20af   :  { %v2664_v11 = vpop.f32.mrf.mxu1 }
0x20bb   :  { %v2827_v15 = vpop.eup %2826 }
0x20bc   :  { %v1925_v10 = vmul.f32 0.6931472, %v2827_v15 }
0x20be   :  { %v1926_v14 = vadd.f32 %v1925_v10, %v1923_v9 }
0x20c0   :  { %v1931_v32 = vadd.f32 %v3415_v13, %v1926_v14 }
0x20c2   :  { %v1932_v33 = vsel %vm1238_vm3, %v1931_v32, -inf }
0x20c3   :  { %1933 = vmax.xlane.f32.xlu1 %v1932_v33 }
0x20d4   :  { %2020 = vperm.xlu1 %2701, %v1961_v29   ;;  %v2071_v29 = vmul.f32 %v3407_v3, %v3289_v23  ;;  %v2677_v23 = vpop.f32.mrf.mxu0 }
0x20d6   :  { %v2085_v50 = vsel %vm1238_vm3, %v2071_v29, 0.0 }
0x20d8   :  { %2023 = vperm.xlu1 %2701, %v3334_v5   ;;  %v2065_v5 = vmul.f32 %v2371_v59, %v3209_v36  ;;  %v2068_v36 = vmul.f32 %v2374_v63, %v3283_v22  ;;  %v2210_v59 = vpop.f32.mrf.mxu0 }
0x20da   :  { %v2680_v11 = vpop.f32.mrf.mxu0 }
0x20dc   :  { %2026 = vperm.xlu1 %2701, %v3340_v18   ;;  %v2064_v18 = vmul.f32 %v3369_v40, %v3214_v38  ;;  %v2079_v38 = vsel %vm1238_vm3, %v2068_v36, 0.0 }
0x20e0   :  { %2029 = vperm.xlu1 %2701, %v3346_v19   ;;  %v2073_v19 = vsel %vm1238_vm3, %v2065_v5, 0.0 }
0x20e4   :  { %2032 = vperm.xlu1 %2701, %v3352_v21   ;;  %v2072_v21 = vsel %vm1238_vm3, %v2064_v18, 0.0 }
0x20e8   :  { %2035 = vperm.xlu1 %2701, %v3358_v30   ;;  %v2066_v30 = vmul.f32 %v2372_v60, %v3271_v16  ;;  %v2070_v16 = vmul.f32 %v2376_v1, %v3295_v24 }
0x20ea   :  { %v2075_v42 = vsel %vm1238_vm3, %v2066_v30, 0.0  ;;  %v2083_v12 = vsel %vm1238_vm3, %v2070_v16, 0.0 }
0x20ec   :  { %2038 = vperm.xlu1 %2701, %v3364_v31   ;;  %v2074_v31 = vadd.f32 %v2073_v19, %v2072_v21 }
0x20ee   :  { %v2076_v45 = vadd.f32 %v2075_v42, %v2074_v31 }
0x20f0   :  { %v2078_v46 = vadd.f32 %v2077_v28, %v2076_v45  ;;  %v2262_v28 = vmul.f32 %v3407_v3, %v3415_v13 }
0x20f2   :  { %v2080_v40 = vadd.f32 %v2079_v38, %v2078_v46 }
0x214c   :  { %v3425_v27 = vpop.xlane.xlu1 %1933 }
0x214d   :  { %v1935_v35 = vsub.f32 %v1931_v32, %v3425_v27 }
0x214f   :  { %v1936_v37 = vmul.f32 1.442695, %v1935_v35 }
0x2150   :  { %v2021_v34 = vpop.permute.xlu1 %2020 }
0x2151   :  { %2828 = vpow2.f32 %v1936_v37  ;;  %vm2041_vm14 = vcmp.eq.s32.totalorder %v2021_v34, %v3097_v39 }
0x2152   :  { %v2379_v56 = vsel %vm2041_vm14, 1.0, %v2854_v2 }
0x2153   :  { %v2230_v62 = vmul.f32 %v2671_v51, %v2379_v56 }
0x2154   :  { %v2024_v25 = vpop.permute.xlu1 %2023 }
0x2155   :  { %vm2042_vm15 = vcmp.eq.s32.totalorder %v2024_v25, %v3097_v39  ;;  %v2238_v15 = vsel %vm1238_vm3, %v2230_v62, 0.0 }
0x2156   :  { %v2380_v58 = vsel %vm2042_vm15, 1.0, %v2854_v2 }
0x215e   :  { %v2829_v26 = vpop.eup %2828 }
0x215f   :  { %v1938_v41 = vsel %vm1238_vm3, %v2829_v26, 0.0 }
0x2160   :  { %1939 = vadd.xlane.f32.xlu0 %v1938_v41  ;;  %v2220_v41 = vpop.f32.mrf.mxu0 }
0x2176   :  { %2017 = vperm.xlu0 %2700, %v3328_v4   ;;  %v2069_v4 = vmul.f32 %v2375_v7, %v3277_v20  ;;  %v2027_v20 = vpop.permute.xlu1 %2026  ;;  %v2231_v7 = vmul.f32 %v2380_v58, %v2200_v53 }
0x2177   :  { %vm2043_vm0 = vcmp.eq.s32.totalorder %v2027_v20, %v3097_v39 }
0x2178   :  { %v2081_v47 = vsel %vm1238_vm3, %v2069_v4, 0.0  ;;  %v2381_v63 = vsel %vm2043_vm0, 1.0, %v2854_v2  ;;  %v2240_v33 = vsel %vm1238_vm3, %v2231_v7, 0.0  ;;  %v2263_v4 = vsel %vm1238_vm3, %v2262_v28, 0.0 }
0x2179   :  { %v2082_v48 = vadd.f32 %v2081_v47, %v2080_v40  ;;  %v2232_v8 = vmul.f32 %v2674_v52, %v2381_v63 }
0x217a   :  { %v2030_v17 = vpop.permute.xlu1 %2029 }
0x217b   :  { %v2084_v49 = vadd.f32 %v2083_v12, %v2082_v48  ;;  %vm2044_vm1 = vcmp.eq.s32.totalorder %v2030_v17, %v3097_v39  ;;  %v2242_v18 = vsel %vm1238_vm3, %v2232_v8, 0.0 }
0x217c   :  { %v2382_v44 = vsel %vm2044_vm1, 1.0, %v2854_v2 }
0x217d   :  { %v2086_v22 = vadd.f32 %v2085_v50, %v2084_v49  ;;  %v2233_v35 = vmul.f32 %v2382_v44, %v2210_v59 }
0x217e   :  { %v2033_v24 = vpop.permute.xlu1 %2032 }
0x217f   :  { %vm2045_vm4 = vcmp.eq.s32.totalorder %v2033_v24, %v3097_v39  ;;  %v2244_v42 = vsel %vm1238_vm3, %v2233_v35, 0.0 }
0x2180   :  { %v2383_v14 = vsel %vm2045_vm4, 1.0, %v2854_v2 }
0x2181   :  { %v2234_v19 = vmul.f32 %v2677_v23, %v2383_v14 }
0x2182   :  { %v2036_v57 = vpop.permute.xlu1 %2035 }
0x2183   :  { %vm2046_vm5 = vcmp.eq.s32.totalorder %v2036_v57, %v3097_v39  ;;  %v2246_v6 = vsel %vm1238_vm3, %v2234_v19, 0.0 }
0x2184   :  { %v2384_v26 = vsel %vm2046_vm5, 1.0, %v2854_v2 }
0x2185   :  { %v2235_v43 = vmul.f32 %v2384_v26, %v2220_v41 }
0x2186   :  { %v2039_v61 = vpop.permute.xlu1 %2038 }
0x2187   :  { %vm2047_vm6 = vcmp.eq.s32.totalorder %v2039_v61, %v3097_v39 }
0x2188   :  { %v2385_v30 = vsel %vm2047_vm6, 1.0, %v2854_v2 }
0x2189   :  { %v2236_v46 = vmul.f32 %v2680_v11, %v2385_v30 }
0x218b   :  { %v2250_v40 = vsel %vm1238_vm3, %v2236_v46, 0.0 }
0x2195   :  { %2087 = vadd.xlane.f32.xlu0 %v2086_v22 }
0x21e9   :  { %v1940_v55 = vpop.xlane.xlu0 %1939 }
0x21ea   :  { %2830 = vlog2.f32 %v1940_v55 }
0x21f1   :  { %v2018_v60 = vpop.permute.xlu0 %2017 }
0x21f2   :  { %vm2040_vm2 = vcmp.eq.s32.totalorder %v2018_v60, %v3097_v39 }
0x21f3   :  { %v2378_v0 = vsel %vm2040_vm2, 1.0, %v2854_v2 }
0x21f4   :  { %v2229_v1 = vmul.f32 %v2378_v0, %v2190_v54 }
0x21f6   :  { %v2237_v9 = vsel %vm1238_vm3, %v2229_v1, 0.0 }
0x21f7   :  { %v2831_v10 = vpop.eup %2830  ;;  %v2239_v32 = vadd.f32 %v2238_v15, %v2237_v9 }
0x21f8   :  { %v1942_v37 = vmul.f32 0.6931472, %v2831_v10 }
0x21f9   :  { %v2241_v5 = vadd.f32 %v2240_v33, %v2239_v32 }
0x21fa   :  { %v1943_v21 = vadd.f32 %v1942_v37, %v3425_v27  ;;  %v2248_v27 = vsel %vm1238_vm3, %v2235_v43, 0.0  ;;  %vm2279_vm3 = vcmask 0  }
0x21fb   :  { %v2243_v31 = vadd.f32 %v2242_v18, %v2241_v5 }
0x21fc   :  { %v1947_v39 = vsel %vm1946_vm7, %v1943_v21, 0.0 }
0x21fd   :  { %v1949_v45 = vsel %vm1948_vm8, %v1947_v39, 0.0  ;;  %v2245_v36 = vadd.f32 %v2244_v42, %v2243_v31 }
0x21fe   :  { %1950 = vadd.xlane.f32.xlu1 %v1949_v45 }
0x21ff   :  { %v2247_v38 = vadd.f32 %v2246_v6, %v2245_v36 }
0x2201   :  { %v2249_v2 = vadd.f32 %v2248_v27, %v2247_v38 }
0x2202   :  { %2264 = vadd.xlane.f32.xlu1 %v2263_v4 }
0x2203   :  { %v2251_v47 = vadd.f32 %v2250_v40, %v2249_v2 }
0x2205   :  { %2252 = vadd.xlane.f32.xlu0 %v2251_v47 }
0x221e   :  { %v2088_v16 = vpop.xlane.xlu0 %2087 }
0x221f   :  { %v2089_v48 = vrot.slane %v2088_v16, 4 }
0x2221   :  { %v2090_v29 = vadd.f32 %v2089_v48, %v2088_v16 }
0x2223   :  { %v2091_v3 = vrot.slane %v2090_v29, 2 }
0x2225   :  { %v2092_v22 = vadd.f32 %v2091_v3, %v2090_v29 }
0x2227   :  { %v2093_v52 = vrot.slane %v2092_v22, 1 }
0x2229   :  { %v2094_v58 = vadd.f32 %v2093_v52, %v2092_v22 }
0x2287   :  { %v1951_v13 = vpop.xlane.xlu1 %1950 }
0x2288   :  { %v1952_v12 = vrot.slane %v1951_v13, 4 }
0x228a   :  { %v1953_v49 = vadd.f32 %v1952_v12, %v1951_v13 }
0x228b   :  { %v2265_v50 = vpop.xlane.xlu1 %2264 }
0x228c   :  { %v1954_v34 = vrot.slane %v1953_v49, 2  ;;  %v2266_v25 = vrot.slane %v2265_v50, 4 }
0x228e   :  { %v2267_v51 = vadd.f32 %v2266_v25, %v2265_v50  ;;  %v2253_v20 = vpop.xlane.xlu0 %2252  ;;  %v1955_v54 = vadd.f32 %v1954_v34, %v1953_v49 }
0x228f   :  { %v2254_v17 = vrot.slane %v2253_v20, 4 }
0x2290   :  { %v2268_v53 = vrot.slane %v2267_v51, 2  ;;  %v1956_v24 = vrot.slane %v1955_v54, 1 }
0x2291   :  { %v2255_v55 = vadd.f32 %v2254_v17, %v2253_v20 }
0x2292   :  { %v2269_v23 = vadd.f32 %v2268_v53, %v2267_v51  ;;  %v1957_v56 = vadd.f32 %v1956_v24, %v1955_v54 }
0x2293   :  { %v2256_v57 = vrot.slane %v2255_v55, 2 }
0x2294   :  { %2681 = vpush %v1957_v56  ;;  %v2270_v60 = vrot.slane %v2269_v23, 1 }
0x2295   :  { %v2257_v59 = vadd.f32 %v2256_v57, %v2255_v55  ;;  %2683 = vpush %v2094_v58 }
0x2296   :  { %v2271_v0 = vadd.f32 %v2270_v60, %v2269_v23 }
0x2297   :  { %v2258_v62 = vrot.slane %v2257_v59, 1 }
0x2299   :  { %v2259_v63 = vadd.f32 %v2258_v62, %v2257_v59 }
0x229b   :  { %2685 = vpush %v2259_v63 }
0x229c   :  { %2687 = vpush %v2271_v0 }
0x22c5   :  { %s2682_s2 = spop %2681 }
0x22c6   :  { %s2684_s23 = spop %2683  ;;  %v1959_v7 = vstv %s2682_s2 }
0x22c7   :  { %v2096_v1 = vstv %s2684_s23 }
0x22c8   :  { %v2274_v44 = vsub.f32 %v1959_v7, %v2096_v1 }
0x22cc   :  { %s2686_s24 = spop %2685 }
0x22cd   :  { %v2261_v11 = vstv %s2686_s24  ;;  %s2688_s25 = spop %2687 }
0x22ce   :  { %v2275_v61 = vsub.f32 %v2274_v44, %v2261_v11  ;;  %v2273_v15 = vstv %s2688_s25 }
0x22d0   :  { %v2276_v8 = vsub.f32 %v2275_v61, %v2273_v15 }
0x22d2   :  { %v2278_v9 = vmul.f32 0.5, %v2276_v8 }
0x22d4   :  { %2280 = vst.msk [vmem:[#allocation6] sm:$0x1] %vm2279_vm3, %v2278_v9 }
0x22d5   :  { %2843 = shalt.err (!%p2840_p4)
}
0x22d6   :  { %2290 = dma.vmem_to_hbm [thread:$0]  %s2288_s27, 16, %s3484_s4, [#allocation7]  }
0x22d7   :  { %2852 = dma.done.wait [#allocation7], 16  }
0x22d8   :  { %2853 = vsyncadd [#allocation7], 4294967280 }
0x22d9   :  { %2294 = vsyncpa [#allocation7], 1 }

</bundles_post_ra>
